<compile_context>
chip_gen: v5e
topology: v5e:2x2
jax: 0.10.0
libtpu: 0.0.40
codegen_flags: <defaults>
</compile_context>

<pallas_src>
import numpy as np
import jax
import jax.numpy as jnp
from jax import lax
from jax.experimental import pallas as pl
from jax.experimental.pallas import tpu as pltpu

H = 50            # real hidden size (PyTorch)
HP = 128          # padded hidden size (lane-aligned)


def lstm_last_linear_kernel(x_ref, whh_ref, par_ref, out_ref):
    """Whole model in one kernel: LSTM recurrence -> last h -> linear.

    x_ref   : (B, T, 1) f32   raw batch-first input (unpadded batch)
    whh_ref : (HP, 4*HP) bf16 hidden->gate weights (transposed), slabs (i,f,o,g)
    par_ref : (4, 4*HP) f32   row 0: w_ih row, row 1: b_ih+b_hh,
                              row 2: [w_lin | 0...], row 3: [b_lin, 0...]
    out_ref : (B, 1) f32
    """
    B, T, _ = x_ref.shape
    hp = whh_ref.shape[0]

    whh = whh_ref[...]                      # (HP, 4*HP) bf16, loaded once
    wih = par_ref[0:1, :]                   # (1, 4*HP)
    bias = par_ref[1:2, :]                  # (1, 4*HP)
    wlin = par_ref[2:3, :hp]                # (1, HP)
    blin = par_ref[3:4, 0:1]                # (1, 1)

    h = jnp.zeros((B, hp), jnp.float32)
    c = jnp.zeros((B, hp), jnp.float32)

    # ---- fully unrolled T-step recurrence (T is static) ----
    for t in range(T):
        # per-step input projection: pure VALU filler under the MXU/EUP chain
        xg = x_ref[:, t, :] * wih + bias                       # (B, 4*HP)
        gates = xg + jnp.dot(h.astype(jnp.bfloat16), whh,
                             preferred_element_type=jnp.float32)
        # gate slabs [i | f | o | g]; tanh-based sigmoid over the first 3*HP
        # lanes: sigmoid(z) = 0.5*tanh(0.5*z) + 0.5 (one EUP op per slab).
        sig = 0.5 * jnp.tanh(0.5 * gates[:, :3 * hp]) + 0.5
        i = sig[:, 0 * hp:1 * hp]
        f = sig[:, 1 * hp:2 * hp]
        o = sig[:, 2 * hp:3 * hp]
        g = jnp.tanh(gates[:, 3 * hp:4 * hp])
        c = f * c + i * g
        h = o * jnp.tanh(c)

    # ---- final Linear(50, 1): VPU multiply + lane reduction (no MXU) ----
    out_ref[...] = jnp.sum(h * wlin, axis=-1, keepdims=True) + blin


def pack_params(w_ih, w_hh, b_ih, b_hh, w_lin, b_lin):
    """Host-side (numpy) one-time packing of PyTorch LSTM/Linear params.

    Returns (whh_p bf16 (HP, 4HP), par_p f32 (4, 4HP)).
    """
    w_ih = np.asarray(w_ih, np.float32)
    w_hh = np.asarray(w_hh, np.float32)
    b_ih = np.asarray(b_ih, np.float32)
    b_hh = np.asarray(b_hh, np.float32)
    w_lin = np.asarray(w_lin, np.float32)
    b_lin = np.asarray(b_lin, np.float32)

    whh_p = np.zeros((HP, 4 * HP), np.float32)
    par_p = np.zeros((4, 4 * HP), np.float32)
    # PyTorch gate row order: (i, f, g, o).  Kernel slab order: (i, f, o, g).
    for slab, pt in ((0, 0), (1, 1), (2, 3), (3, 2)):
        par_p[0, slab * HP:slab * HP + H] = w_ih[pt * H:(pt + 1) * H, 0]
        whh_p[:H, slab * HP:slab * HP + H] = w_hh[pt * H:(pt + 1) * H, :].T
        par_p[1, slab * HP:slab * HP + H] = (b_ih[pt * H:(pt + 1) * H]
                                             + b_hh[pt * H:(pt + 1) * H])
    par_p[2, :H] = w_lin[0]
    par_p[3, 0] = b_lin[0]

    # W_hh is pre-cast to bf16 (MXU operand); everything else stays f32.
    return jnp.asarray(whh_p, jnp.bfloat16), jnp.asarray(par_p)


@jax.jit
def forward(x, whh_p, par_p):
    """x: (B, T, 1) float32.  Returns (B, 1) float32 (matches PyTorch module)."""
    B = x.shape[0]
    return pl.pallas_call(
        lstm_last_linear_kernel,
        out_shape=jax.ShapeDtypeStruct((B, 1), jnp.float32),
        in_specs=[pl.BlockSpec(memory_space=pltpu.MemorySpace.VMEM)] * 3,
        out_specs=pl.BlockSpec(memory_space=pltpu.MemorySpace.VMEM),
    )(x, whh_p, par_p)


def ref_forward(x, w_ih, w_hh, b_ih, b_hh, w_lin, b_lin):
    """Pure-JAX f32 reference of the PyTorch module (for verification)."""
    B = x.shape[0]

    def step(carry, x_t):
        h, c = carry
        gates = x_t @ w_ih.T + h @ w_hh.T + b_ih + b_hh
        i, f, g, o = jnp.split(gates, 4, axis=-1)          # PyTorch order
        i, f, o = jax.nn.sigmoid(i), jax.nn.sigmoid(f), jax.nn.sigmoid(o)
        g = jnp.tanh(g)
        c = f * c + i * g
        h = o * jnp.tanh(c)
        return (h, c), None

    h0 = jnp.zeros((B, H), jnp.float32)
    (h_last, _), _ = lax.scan(step, (h0, h0), jnp.transpose(x, (1, 0, 2)))
    return h_last @ w_lin.T + b_lin


if __name__ == "__main__":
    # Small shapes consistent with the module: batch=2, seq=8, input_size=1.
    B, T = 2, 8
    key = jax.random.PRNGKey(0)
    kx, k1, k2, k3, k4, k5, k6 = jax.random.split(key, 7)

    x = jax.random.normal(kx, (B, T, 1), dtype=jnp.float32)

    # Deterministic param init (PyTorch default: U(-1/sqrt(H), 1/sqrt(H))).
    bound = 1.0 / np.sqrt(H)
    w_ih = jax.random.uniform(k1, (4 * H, 1), minval=-bound, maxval=bound, dtype=jnp.float32)
    w_hh = jax.random.uniform(k2, (4 * H, H), minval=-bound, maxval=bound, dtype=jnp.float32)
    b_ih = jax.random.uniform(k3, (4 * H,), minval=-bound, maxval=bound, dtype=jnp.float32)
    b_hh = jax.random.uniform(k4, (4 * H,), minval=-bound, maxval=bound, dtype=jnp.float32)
    w_lin = jax.random.uniform(k5, (1, H), minval=-bound, maxval=bound, dtype=jnp.float32)
    b_lin = jax.random.uniform(k6, (1,), minval=-bound, maxval=bound, dtype=jnp.float32)

    # One-time host-side packing (amortized out of the per-call path).
    whh_p, par_p = pack_params(w_ih, w_hh, b_ih, b_hh, w_lin, b_lin)

    out = forward(x, whh_p, par_p)
    out = jax.block_until_ready(out)

    ref = ref_forward(x, w_ih, w_hh, b_ih, b_hh, w_lin, b_lin)
    ref = jax.block_until_ready(ref)

    assert out.shape == (B, 1), out.shape
    # The exp+approx-reciprocal sigmoid is gone (exact tanh-based sigmoid), so
    # the only deviation from the f32 reference is the bf16 cast of the MXU
    # operands (h, W_hh) with f32 accumulation: expected error ~1e-4.  The
    # 2e-3 bound keeps a comfortable margin over the 8-step recurrence.
    np.testing.assert_allclose(np.asarray(out), np.asarray(ref),
                               rtol=2e-3, atol=2e-3)
    print("KERNEL_OK")
</pallas_src>

<mosaic_0001>
module attributes {stable_mosaic.version = 11 : i64} {
  func.func @lstm_last_linear_kernel(%arg0: memref<2x8x1xf32, #tpu.memory_space<vmem>>, %arg1: memref<128x512xbf16, #tpu.memory_space<vmem>>, %arg2: memref<4x512xf32, #tpu.memory_space<vmem>>, %arg3: memref<2x1xf32, #tpu.memory_space<vmem>>) attributes {dimension_semantics = [], scalar_prefetch = 0 : i64, scratch_operands = 0 : i64, tpu.core_type = #tpu.core_type<tc>} {
    %c0 = arith.constant 0 : index
    %c0_0 = arith.constant 0 : index
    %0 = vector.load %arg1[%c0, %c0_0] : memref<128x512xbf16, #tpu.memory_space<vmem>>, vector<128x512xbf16>
    %c0_1 = arith.constant 0 : index
    %c0_2 = arith.constant 0 : index
    %1 = vector.load %arg2[%c0_1, %c0_2] : memref<4x512xf32, #tpu.memory_space<vmem>>, vector<1x512xf32>
    %c1 = arith.constant 1 : index
    %c0_3 = arith.constant 0 : index
    %2 = vector.load %arg2[%c1, %c0_3] : memref<4x512xf32, #tpu.memory_space<vmem>>, vector<1x512xf32>
    %c2 = arith.constant 2 : index
    %c0_4 = arith.constant 0 : index
    %3 = vector.load %arg2[%c2, %c0_4] : memref<4x512xf32, #tpu.memory_space<vmem>>, vector<1x128xf32>
    %c3 = arith.constant 3 : index
    %c0_5 = arith.constant 0 : index
    %4 = vector.load %arg2[%c3, %c0_5] : memref<4x512xf32, #tpu.memory_space<vmem>>, vector<1x1xf32>
    %cst = arith.constant 0.000000e+00 : f32
    %5 = vector.broadcast %cst : f32 to vector<2x128xf32>
    %cst_6 = arith.constant 0.000000e+00 : f32
    %6 = vector.broadcast %cst_6 : f32 to vector<2x128xf32>
    %c0_7 = arith.constant 0 : index
    %c0_8 = arith.constant 0 : index
    %c0_9 = arith.constant 0 : index
    %7 = vector.load %arg0[%c0_7, %c0_8, %c0_9] : memref<2x8x1xf32, #tpu.memory_space<vmem>>, vector<2x1x1xf32>
    %8 = vector.shape_cast %7 : vector<2x1x1xf32> to vector<2x1xf32>
    %9 = vector.broadcast %8 : vector<2x1xf32> to vector<2x512xf32>
    %10 = vector.broadcast %1 : vector<1x512xf32> to vector<2x512xf32>
    %11 = arith.mulf %9, %10 : vector<2x512xf32>
    %12 = vector.broadcast %2 : vector<1x512xf32> to vector<2x512xf32>
    %13 = arith.addf %11, %12 : vector<2x512xf32>
    %14 = arith.truncf %5 : vector<2x128xf32> to vector<2x128xbf16>
    %cst_10 = arith.constant dense<0.000000e+00> : vector<2x512xf32>
    %15 = tpu.matmul %14, %0, %cst_10 {dimension_numbers = #tpu.dot_dimension_numbers<[1], [0], [0], [1], [0, 0, 1, 1], [], []>} : vector<2x128xbf16>, vector<128x512xbf16>, vector<2x512xf32> -> vector<2x512xf32>
    %16 = arith.addf %13, %15 : vector<2x512xf32>
    %17 = vector.extract_strided_slice %16 {offsets = [0, 0], sizes = [2, 384], strides = [1, 1]} : vector<2x512xf32> to vector<2x384xf32>
    %cst_11 = arith.constant 5.000000e-01 : f32
    %18 = vector.broadcast %cst_11 : f32 to vector<2x384xf32>
    %19 = arith.mulf %18, %17 : vector<2x384xf32>
    %20 = math.tanh %19 : vector<2x384xf32>
    %cst_12 = arith.constant 5.000000e-01 : f32
    %21 = vector.broadcast %cst_12 : f32 to vector<2x384xf32>
    %22 = arith.mulf %21, %20 : vector<2x384xf32>
    %cst_13 = arith.constant 5.000000e-01 : f32
    %23 = vector.broadcast %cst_13 : f32 to vector<2x384xf32>
    %24 = arith.addf %22, %23 : vector<2x384xf32>
    %25 = vector.extract_strided_slice %24 {offsets = [0, 0], sizes = [2, 128], strides = [1, 1]} : vector<2x384xf32> to vector<2x128xf32>
    %26 = vector.extract_strided_slice %24 {offsets = [0, 128], sizes = [2, 128], strides = [1, 1]} : vector<2x384xf32> to vector<2x128xf32>
    %27 = vector.extract_strided_slice %24 {offsets = [0, 256], sizes = [2, 128], strides = [1, 1]} : vector<2x384xf32> to vector<2x128xf32>
    %28 = vector.extract_strided_slice %16 {offsets = [0, 384], sizes = [2, 128], strides = [1, 1]} : vector<2x512xf32> to vector<2x128xf32>
    %29 = math.tanh %28 : vector<2x128xf32>
    %30 = arith.mulf %26, %6 : vector<2x128xf32>
    %31 = arith.mulf %25, %29 : vector<2x128xf32>
    %32 = arith.addf %30, %31 : vector<2x128xf32>
    %33 = math.tanh %32 : vector<2x128xf32>
    %34 = arith.mulf %27, %33 : vector<2x128xf32>
    %c0_14 = arith.constant 0 : index
    %c1_15 = arith.constant 1 : index
    %c0_16 = arith.constant 0 : index
    %35 = vector.load %arg0[%c0_14, %c1_15, %c0_16] : memref<2x8x1xf32, #tpu.memory_space<vmem>>, vector<2x1x1xf32>
    %36 = vector.shape_cast %35 : vector<2x1x1xf32> to vector<2x1xf32>
    %37 = vector.broadcast %36 : vector<2x1xf32> to vector<2x512xf32>
    %38 = vector.broadcast %1 : vector<1x512xf32> to vector<2x512xf32>
    %39 = arith.mulf %37, %38 : vector<2x512xf32>
    %40 = vector.broadcast %2 : vector<1x512xf32> to vector<2x512xf32>
    %41 = arith.addf %39, %40 : vector<2x512xf32>
    %42 = arith.truncf %34 : vector<2x128xf32> to vector<2x128xbf16>
    %cst_17 = arith.constant dense<0.000000e+00> : vector<2x512xf32>
    %43 = tpu.matmul %42, %0, %cst_17 {dimension_numbers = #tpu.dot_dimension_numbers<[1], [0], [0], [1], [0, 0, 1, 1], [], []>} : vector<2x128xbf16>, vector<128x512xbf16>, vector<2x512xf32> -> vector<2x512xf32>
    %44 = arith.addf %41, %43 : vector<2x512xf32>
    %45 = vector.extract_strided_slice %44 {offsets = [0, 0], sizes = [2, 384], strides = [1, 1]} : vector<2x512xf32> to vector<2x384xf32>
    %cst_18 = arith.constant 5.000000e-01 : f32
    %46 = vector.broadcast %cst_18 : f32 to vector<2x384xf32>
    %47 = arith.mulf %46, %45 : vector<2x384xf32>
    %48 = math.tanh %47 : vector<2x384xf32>
    %cst_19 = arith.constant 5.000000e-01 : f32
    %49 = vector.broadcast %cst_19 : f32 to vector<2x384xf32>
    %50 = arith.mulf %49, %48 : vector<2x384xf32>
    %cst_20 = arith.constant 5.000000e-01 : f32
    %51 = vector.broadcast %cst_20 : f32 to vector<2x384xf32>
    %52 = arith.addf %50, %51 : vector<2x384xf32>
    %53 = vector.extract_strided_slice %52 {offsets = [0, 0], sizes = [2, 128], strides = [1, 1]} : vector<2x384xf32> to vector<2x128xf32>
    %54 = vector.extract_strided_slice %52 {offsets = [0, 128], sizes = [2, 128], strides = [1, 1]} : vector<2x384xf32> to vector<2x128xf32>
    %55 = vector.extract_strided_slice %52 {offsets = [0, 256], sizes = [2, 128], strides = [1, 1]} : vector<2x384xf32> to vector<2x128xf32>
    %56 = vector.extract_strided_slice %44 {offsets = [0, 384], sizes = [2, 128], strides = [1, 1]} : vector<2x512xf32> to vector<2x128xf32>
    %57 = math.tanh %56 : vector<2x128xf32>
    %58 = arith.mulf %54, %32 : vector<2x128xf32>
    %59 = arith.mulf %53, %57 : vector<2x128xf32>
    %60 = arith.addf %58, %59 : vector<2x128xf32>
    %61 = math.tanh %60 : vector<2x128xf32>
    %62 = arith.mulf %55, %61 : vector<2x128xf32>
    %c0_21 = arith.constant 0 : index
    %c2_22 = arith.constant 2 : index
    %c0_23 = arith.constant 0 : index
    %63 = vector.load %arg0[%c0_21, %c2_22, %c0_23] : memref<2x8x1xf32, #tpu.memory_space<vmem>>, vector<2x1x1xf32>
    %64 = vector.shape_cast %63 : vector<2x1x1xf32> to vector<2x1xf32>
    %65 = vector.broadcast %64 : vector<2x1xf32> to vector<2x512xf32>
    %66 = vector.broadcast %1 : vector<1x512xf32> to vector<2x512xf32>
    %67 = arith.mulf %65, %66 : vector<2x512xf32>
    %68 = vector.broadcast %2 : vector<1x512xf32> to vector<2x512xf32>
    %69 = arith.addf %67, %68 : vector<2x512xf32>
    %70 = arith.truncf %62 : vector<2x128xf32> to vector<2x128xbf16>
    %cst_24 = arith.constant dense<0.000000e+00> : vector<2x512xf32>
    %71 = tpu.matmul %70, %0, %cst_24 {dimension_numbers = #tpu.dot_dimension_numbers<[1], [0], [0], [1], [0, 0, 1, 1], [], []>} : vector<2x128xbf16>, vector<128x512xbf16>, vector<2x512xf32> -> vector<2x512xf32>
    %72 = arith.addf %69, %71 : vector<2x512xf32>
    %73 = vector.extract_strided_slice %72 {offsets = [0, 0], sizes = [2, 384], strides = [1, 1]} : vector<2x512xf32> to vector<2x384xf32>
    %cst_25 = arith.constant 5.000000e-01 : f32
    %74 = vector.broadcast %cst_25 : f32 to vector<2x384xf32>
    %75 = arith.mulf %74, %73 : vector<2x384xf32>
    %76 = math.tanh %75 : vector<2x384xf32>
    %cst_26 = arith.constant 5.000000e-01 : f32
    %77 = vector.broadcast %cst_26 : f32 to vector<2x384xf32>
    %78 = arith.mulf %77, %76 : vector<2x384xf32>
    %cst_27 = arith.constant 5.000000e-01 : f32
    %79 = vector.broadcast %cst_27 : f32 to vector<2x384xf32>
    %80 = arith.addf %78, %79 : vector<2x384xf32>
    %81 = vector.extract_strided_slice %80 {offsets = [0, 0], sizes = [2, 128], strides = [1, 1]} : vector<2x384xf32> to vector<2x128xf32>
    %82 = vector.extract_strided_slice %80 {offsets = [0, 128], sizes = [2, 128], strides = [1, 1]} : vector<2x384xf32> to vector<2x128xf32>
    %83 = vector.extract_strided_slice %80 {offsets = [0, 256], sizes = [2, 128], strides = [1, 1]} : vector<2x384xf32> to vector<2x128xf32>
    %84 = vector.extract_strided_slice %72 {offsets = [0, 384], sizes = [2, 128], strides = [1, 1]} : vector<2x512xf32> to vector<2x128xf32>
    %85 = math.tanh %84 : vector<2x128xf32>
    %86 = arith.mulf %82, %60 : vector<2x128xf32>
    %87 = arith.mulf %81, %85 : vector<2x128xf32>
    %88 = arith.addf %86, %87 : vector<2x128xf32>
    %89 = math.tanh %88 : vector<2x128xf32>
    %90 = arith.mulf %83, %89 : vector<2x128xf32>
    %c0_28 = arith.constant 0 : index
    %c3_29 = arith.constant 3 : index
    %c0_30 = arith.constant 0 : index
    %91 = vector.load %arg0[%c0_28, %c3_29, %c0_30] : memref<2x8x1xf32, #tpu.memory_space<vmem>>, vector<2x1x1xf32>
    %92 = vector.shape_cast %91 : vector<2x1x1xf32> to vector<2x1xf32>
    %93 = vector.broadcast %92 : vector<2x1xf32> to vector<2x512xf32>
    %94 = vector.broadcast %1 : vector<1x512xf32> to vector<2x512xf32>
    %95 = arith.mulf %93, %94 : vector<2x512xf32>
    %96 = vector.broadcast %2 : vector<1x512xf32> to vector<2x512xf32>
    %97 = arith.addf %95, %96 : vector<2x512xf32>
    %98 = arith.truncf %90 : vector<2x128xf32> to vector<2x128xbf16>
    %cst_31 = arith.constant dense<0.000000e+00> : vector<2x512xf32>
    %99 = tpu.matmul %98, %0, %cst_31 {dimension_numbers = #tpu.dot_dimension_numbers<[1], [0], [0], [1], [0, 0, 1, 1], [], []>} : vector<2x128xbf16>, vector<128x512xbf16>, vector<2x512xf32> -> vector<2x512xf32>
    %100 = arith.addf %97, %99 : vector<2x512xf32>
    %101 = vector.extract_strided_slice %100 {offsets = [0, 0], sizes = [2, 384], strides = [1, 1]} : vector<2x512xf32> to vector<2x384xf32>
    %cst_32 = arith.constant 5.000000e-01 : f32
    %102 = vector.broadcast %cst_32 : f32 to vector<2x384xf32>
    %103 = arith.mulf %102, %101 : vector<2x384xf32>
    %104 = math.tanh %103 : vector<2x384xf32>
    %cst_33 = arith.constant 5.000000e-01 : f32
    %105 = vector.broadcast %cst_33 : f32 to vector<2x384xf32>
    %106 = arith.mulf %105, %104 : vector<2x384xf32>
    %cst_34 = arith.constant 5.000000e-01 : f32
    %107 = vector.broadcast %cst_34 : f32 to vector<2x384xf32>
    %108 = arith.addf %106, %107 : vector<2x384xf32>
    %109 = vector.extract_strided_slice %108 {offsets = [0, 0], sizes = [2, 128], strides = [1, 1]} : vector<2x384xf32> to vector<2x128xf32>
    %110 = vector.extract_strided_slice %108 {offsets = [0, 128], sizes = [2, 128], strides = [1, 1]} : vector<2x384xf32> to vector<2x128xf32>
    %111 = vector.extract_strided_slice %108 {offsets = [0, 256], sizes = [2, 128], strides = [1, 1]} : vector<2x384xf32> to vector<2x128xf32>
    %112 = vector.extract_strided_slice %100 {offsets = [0, 384], sizes = [2, 128], strides = [1, 1]} : vector<2x512xf32> to vector<2x128xf32>
    %113 = math.tanh %112 : vector<2x128xf32>
    %114 = arith.mulf %110, %88 : vector<2x128xf32>
    %115 = arith.mulf %109, %113 : vector<2x128xf32>
    %116 = arith.addf %114, %115 : vector<2x128xf32>
    %117 = math.tanh %116 : vector<2x128xf32>
    %118 = arith.mulf %111, %117 : vector<2x128xf32>
    %c0_35 = arith.constant 0 : index
    %c4 = arith.constant 4 : index
    %c0_36 = arith.constant 0 : index
    %119 = vector.load %arg0[%c0_35, %c4, %c0_36] : memref<2x8x1xf32, #tpu.memory_space<vmem>>, vector<2x1x1xf32>
    %120 = vector.shape_cast %119 : vector<2x1x1xf32> to vector<2x1xf32>
    %121 = vector.broadcast %120 : vector<2x1xf32> to vector<2x512xf32>
    %122 = vector.broadcast %1 : vector<1x512xf32> to vector<2x512xf32>
    %123 = arith.mulf %121, %122 : vector<2x512xf32>
    %124 = vector.broadcast %2 : vector<1x512xf32> to vector<2x512xf32>
    %125 = arith.addf %123, %124 : vector<2x512xf32>
    %126 = arith.truncf %118 : vector<2x128xf32> to vector<2x128xbf16>
    %cst_37 = arith.constant dense<0.000000e+00> : vector<2x512xf32>
    %127 = tpu.matmul %126, %0, %cst_37 {dimension_numbers = #tpu.dot_dimension_numbers<[1], [0], [0], [1], [0, 0, 1, 1], [], []>} : vector<2x128xbf16>, vector<128x512xbf16>, vector<2x512xf32> -> vector<2x512xf32>
    %128 = arith.addf %125, %127 : vector<2x512xf32>
    %129 = vector.extract_strided_slice %128 {offsets = [0, 0], sizes = [2, 384], strides = [1, 1]} : vector<2x512xf32> to vector<2x384xf32>
    %cst_38 = arith.constant 5.000000e-01 : f32
    %130 = vector.broadcast %cst_38 : f32 to vector<2x384xf32>
    %131 = arith.mulf %130, %129 : vector<2x384xf32>
    %132 = math.tanh %131 : vector<2x384xf32>
    %cst_39 = arith.constant 5.000000e-01 : f32
    %133 = vector.broadcast %cst_39 : f32 to vector<2x384xf32>
    %134 = arith.mulf %133, %132 : vector<2x384xf32>
    %cst_40 = arith.constant 5.000000e-01 : f32
    %135 = vector.broadcast %cst_40 : f32 to vector<2x384xf32>
    %136 = arith.addf %134, %135 : vector<2x384xf32>
    %137 = vector.extract_strided_slice %136 {offsets = [0, 0], sizes = [2, 128], strides = [1, 1]} : vector<2x384xf32> to vector<2x128xf32>
    %138 = vector.extract_strided_slice %136 {offsets = [0, 128], sizes = [2, 128], strides = [1, 1]} : vector<2x384xf32> to vector<2x128xf32>
    %139 = vector.extract_strided_slice %136 {offsets = [0, 256], sizes = [2, 128], strides = [1, 1]} : vector<2x384xf32> to vector<2x128xf32>
    %140 = vector.extract_strided_slice %128 {offsets = [0, 384], sizes = [2, 128], strides = [1, 1]} : vector<2x512xf32> to vector<2x128xf32>
    %141 = math.tanh %140 : vector<2x128xf32>
    %142 = arith.mulf %138, %116 : vector<2x128xf32>
    %143 = arith.mulf %137, %141 : vector<2x128xf32>
    %144 = arith.addf %142, %143 : vector<2x128xf32>
    %145 = math.tanh %144 : vector<2x128xf32>
    %146 = arith.mulf %139, %145 : vector<2x128xf32>
    %c0_41 = arith.constant 0 : index
    %c5 = arith.constant 5 : index
    %c0_42 = arith.constant 0 : index
    %147 = vector.load %arg0[%c0_41, %c5, %c0_42] : memref<2x8x1xf32, #tpu.memory_space<vmem>>, vector<2x1x1xf32>
    %148 = vector.shape_cast %147 : vector<2x1x1xf32> to vector<2x1xf32>
    %149 = vector.broadcast %148 : vector<2x1xf32> to vector<2x512xf32>
    %150 = vector.broadcast %1 : vector<1x512xf32> to vector<2x512xf32>
    %151 = arith.mulf %149, %150 : vector<2x512xf32>
    %152 = vector.broadcast %2 : vector<1x512xf32> to vector<2x512xf32>
    %153 = arith.addf %151, %152 : vector<2x512xf32>
    %154 = arith.truncf %146 : vector<2x128xf32> to vector<2x128xbf16>
    %cst_43 = arith.constant dense<0.000000e+00> : vector<2x512xf32>
    %155 = tpu.matmul %154, %0, %cst_43 {dimension_numbers = #tpu.dot_dimension_numbers<[1], [0], [0], [1], [0, 0, 1, 1], [], []>} : vector<2x128xbf16>, vector<128x512xbf16>, vector<2x512xf32> -> vector<2x512xf32>
    %156 = arith.addf %153, %155 : vector<2x512xf32>
    %157 = vector.extract_strided_slice %156 {offsets = [0, 0], sizes = [2, 384], strides = [1, 1]} : vector<2x512xf32> to vector<2x384xf32>
    %cst_44 = arith.constant 5.000000e-01 : f32
    %158 = vector.broadcast %cst_44 : f32 to vector<2x384xf32>
    %159 = arith.mulf %158, %157 : vector<2x384xf32>
    %160 = math.tanh %159 : vector<2x384xf32>
    %cst_45 = arith.constant 5.000000e-01 : f32
    %161 = vector.broadcast %cst_45 : f32 to vector<2x384xf32>
    %162 = arith.mulf %161, %160 : vector<2x384xf32>
    %cst_46 = arith.constant 5.000000e-01 : f32
    %163 = vector.broadcast %cst_46 : f32 to vector<2x384xf32>
    %164 = arith.addf %162, %163 : vector<2x384xf32>
    %165 = vector.extract_strided_slice %164 {offsets = [0, 0], sizes = [2, 128], strides = [1, 1]} : vector<2x384xf32> to vector<2x128xf32>
    %166 = vector.extract_strided_slice %164 {offsets = [0, 128], sizes = [2, 128], strides = [1, 1]} : vector<2x384xf32> to vector<2x128xf32>
    %167 = vector.extract_strided_slice %164 {offsets = [0, 256], sizes = [2, 128], strides = [1, 1]} : vector<2x384xf32> to vector<2x128xf32>
    %168 = vector.extract_strided_slice %156 {offsets = [0, 384], sizes = [2, 128], strides = [1, 1]} : vector<2x512xf32> to vector<2x128xf32>
    %169 = math.tanh %168 : vector<2x128xf32>
    %170 = arith.mulf %166, %144 : vector<2x128xf32>
    %171 = arith.mulf %165, %169 : vector<2x128xf32>
    %172 = arith.addf %170, %171 : vector<2x128xf32>
    %173 = math.tanh %172 : vector<2x128xf32>
    %174 = arith.mulf %167, %173 : vector<2x128xf32>
    %c0_47 = arith.constant 0 : index
    %c6 = arith.constant 6 : index
    %c0_48 = arith.constant 0 : index
    %175 = vector.load %arg0[%c0_47, %c6, %c0_48] : memref<2x8x1xf32, #tpu.memory_space<vmem>>, vector<2x1x1xf32>
    %176 = vector.shape_cast %175 : vector<2x1x1xf32> to vector<2x1xf32>
    %177 = vector.broadcast %176 : vector<2x1xf32> to vector<2x512xf32>
    %178 = vector.broadcast %1 : vector<1x512xf32> to vector<2x512xf32>
    %179 = arith.mulf %177, %178 : vector<2x512xf32>
    %180 = vector.broadcast %2 : vector<1x512xf32> to vector<2x512xf32>
    %181 = arith.addf %179, %180 : vector<2x512xf32>
    %182 = arith.truncf %174 : vector<2x128xf32> to vector<2x128xbf16>
    %cst_49 = arith.constant dense<0.000000e+00> : vector<2x512xf32>
    %183 = tpu.matmul %182, %0, %cst_49 {dimension_numbers = #tpu.dot_dimension_numbers<[1], [0], [0], [1], [0, 0, 1, 1], [], []>} : vector<2x128xbf16>, vector<128x512xbf16>, vector<2x512xf32> -> vector<2x512xf32>
    %184 = arith.addf %181, %183 : vector<2x512xf32>
    %185 = vector.extract_strided_slice %184 {offsets = [0, 0], sizes = [2, 384], strides = [1, 1]} : vector<2x512xf32> to vector<2x384xf32>
    %cst_50 = arith.constant 5.000000e-01 : f32
    %186 = vector.broadcast %cst_50 : f32 to vector<2x384xf32>
    %187 = arith.mulf %186, %185 : vector<2x384xf32>
    %188 = math.tanh %187 : vector<2x384xf32>
    %cst_51 = arith.constant 5.000000e-01 : f32
    %189 = vector.broadcast %cst_51 : f32 to vector<2x384xf32>
    %190 = arith.mulf %189, %188 : vector<2x384xf32>
    %cst_52 = arith.constant 5.000000e-01 : f32
    %191 = vector.broadcast %cst_52 : f32 to vector<2x384xf32>
    %192 = arith.addf %190, %191 : vector<2x384xf32>
    %193 = vector.extract_strided_slice %192 {offsets = [0, 0], sizes = [2, 128], strides = [1, 1]} : vector<2x384xf32> to vector<2x128xf32>
    %194 = vector.extract_strided_slice %192 {offsets = [0, 128], sizes = [2, 128], strides = [1, 1]} : vector<2x384xf32> to vector<2x128xf32>
    %195 = vector.extract_strided_slice %192 {offsets = [0, 256], sizes = [2, 128], strides = [1, 1]} : vector<2x384xf32> to vector<2x128xf32>
    %196 = vector.extract_strided_slice %184 {offsets = [0, 384], sizes = [2, 128], strides = [1, 1]} : vector<2x512xf32> to vector<2x128xf32>
    %197 = math.tanh %196 : vector<2x128xf32>
    %198 = arith.mulf %194, %172 : vector<2x128xf32>
    %199 = arith.mulf %193, %197 : vector<2x128xf32>
    %200 = arith.addf %198, %199 : vector<2x128xf32>
    %201 = math.tanh %200 : vector<2x128xf32>
    %202 = arith.mulf %195, %201 : vector<2x128xf32>
    %c0_53 = arith.constant 0 : index
    %c7 = arith.constant 7 : index
    %c0_54 = arith.constant 0 : index
    %203 = vector.load %arg0[%c0_53, %c7, %c0_54] : memref<2x8x1xf32, #tpu.memory_space<vmem>>, vector<2x1x1xf32>
    %204 = vector.shape_cast %203 : vector<2x1x1xf32> to vector<2x1xf32>
    %205 = vector.broadcast %204 : vector<2x1xf32> to vector<2x512xf32>
    %206 = vector.broadcast %1 : vector<1x512xf32> to vector<2x512xf32>
    %207 = arith.mulf %205, %206 : vector<2x512xf32>
    %208 = vector.broadcast %2 : vector<1x512xf32> to vector<2x512xf32>
    %209 = arith.addf %207, %208 : vector<2x512xf32>
    %210 = arith.truncf %202 : vector<2x128xf32> to vector<2x128xbf16>
    %cst_55 = arith.constant dense<0.000000e+00> : vector<2x512xf32>
    %211 = tpu.matmul %210, %0, %cst_55 {dimension_numbers = #tpu.dot_dimension_numbers<[1], [0], [0], [1], [0, 0, 1, 1], [], []>} : vector<2x128xbf16>, vector<128x512xbf16>, vector<2x512xf32> -> vector<2x512xf32>
    %212 = arith.addf %209, %211 : vector<2x512xf32>
    %213 = vector.extract_strided_slice %212 {offsets = [0, 0], sizes = [2, 384], strides = [1, 1]} : vector<2x512xf32> to vector<2x384xf32>
    %cst_56 = arith.constant 5.000000e-01 : f32
    %214 = vector.broadcast %cst_56 : f32 to vector<2x384xf32>
    %215 = arith.mulf %214, %213 : vector<2x384xf32>
    %216 = math.tanh %215 : vector<2x384xf32>
    %cst_57 = arith.constant 5.000000e-01 : f32
    %217 = vector.broadcast %cst_57 : f32 to vector<2x384xf32>
    %218 = arith.mulf %217, %216 : vector<2x384xf32>
    %cst_58 = arith.constant 5.000000e-01 : f32
    %219 = vector.broadcast %cst_58 : f32 to vector<2x384xf32>
    %220 = arith.addf %218, %219 : vector<2x384xf32>
    %221 = vector.extract_strided_slice %220 {offsets = [0, 0], sizes = [2, 128], strides = [1, 1]} : vector<2x384xf32> to vector<2x128xf32>
    %222 = vector.extract_strided_slice %220 {offsets = [0, 128], sizes = [2, 128], strides = [1, 1]} : vector<2x384xf32> to vector<2x128xf32>
    %223 = vector.extract_strided_slice %220 {offsets = [0, 256], sizes = [2, 128], strides = [1, 1]} : vector<2x384xf32> to vector<2x128xf32>
    %224 = vector.extract_strided_slice %212 {offsets = [0, 384], sizes = [2, 128], strides = [1, 1]} : vector<2x512xf32> to vector<2x128xf32>
    %225 = math.tanh %224 : vector<2x128xf32>
    %226 = arith.mulf %222, %200 : vector<2x128xf32>
    %227 = arith.mulf %221, %225 : vector<2x128xf32>
    %228 = arith.addf %226, %227 : vector<2x128xf32>
    %229 = math.tanh %228 : vector<2x128xf32>
    %230 = arith.mulf %223, %229 : vector<2x128xf32>
    %231 = vector.broadcast %3 : vector<1x128xf32> to vector<2x128xf32>
    %232 = arith.mulf %230, %231 : vector<2x128xf32>
    %cst_59 = arith.constant dense<0.000000e+00> : vector<2xf32>
    %233 = vector.multi_reduction <add>, %232, %cst_59 [1] : vector<2x128xf32> to vector<2xf32>
    %234 = vector.shape_cast %233 : vector<2xf32> to vector<2x1xf32>
    %235 = vector.broadcast %4 : vector<1x1xf32> to vector<2x1xf32>
    %236 = arith.addf %234, %235 : vector<2x1xf32>
    %c0_60 = arith.constant 0 : index
    %c0_61 = arith.constant 0 : index
    %237 = vector.load %arg3[%c0_60, %c0_61] : memref<2x1xf32, #tpu.memory_space<vmem>>, vector<2x1xf32>
    tpu.vector_store %arg3[%c0_60, %c0_61], %236 {strides = array<i32>} : memref<2x1xf32, #tpu.memory_space<vmem>>, vector<2x1xf32>,
    return
  }
}

</mosaic_0001>

<bundles_post_ra>
// kernel: forward.1
= control target key start
LH: loop header
LB: loop body
LE: loop exit
PB: predicated region body
PF: predicated region fallthrough
CT: control target
= control target key end

     0   :  { %8 = vsyncpa [#allocation3], 0  ;;  %s1814_s15 = smov [#allocation2]   ;;  %s1815_s17 = smov 256   ;;  %s2439_s0 = inlined_call_operand.vmem [shape: f32[2,8,1], index: 0, kind: input, shape index: {}]   ;;  %s2440_s1 = inlined_call_operand.hbm [shape: bf16[128,512], index: 1, kind: input, shape index: {}]   ;;  %s2441_s2 = inlined_call_operand.vmem [shape: f32[4,512], index: 2, kind: input, shape index: {}]   ;;  %s2442_s3 = inlined_call_operand.vmem [shape: f32[2,1], index: 3, kind: output, shape index: {}]  }
   0x1   :  { %s15_s14 = sshll.u32 %s2440_s1, 4  ;;  %s17_s16 = sshll.u32 %s1814_s15, 4  ;;  %s16_s14 = int_to_ptr.hbm [resolvable:$true] %s15_s14  ;;  %s18_s16 = int_to_ptr.vmem [resolvable:$true] %s17_s16 }
   0x2   :  { %s1816_s18 = smov 16  }
   0x3   :  { %23 = dma.hbm_to_vmem [thread:$0]  %s16_s14, 4096, %s18_s16, [#allocation3], %s1815_s17, %s1815_s17, %s1816_s18  }
   0x4   :  { %1812 = dma.done.wait [#allocation3], 4096  }
   0x5   :  { %1813 = vsyncadd [#allocation3], 4294963200  ;;  %v1817_v0 = vmov 0   ;;  %v69_v1 = vld [vmem:[%s2439_s0 + $0x8] sm:$0x1]  ;;  %vm421_vm0 = vcmask 1041409  }
   0x6   :  { %1623 = vset.pattern.permute.xlu0 %v1817_v0  ;;  %1624 = vset.pattern.permute.xlu1 %v1817_v0  ;;  %v1573_v2 = vld [vmem:[#allocation2 + $0xe0] sm:$0xf]  ;;  %v1617_v3 = vld [vmem:[#allocation2 + $0xec] sm:$0xf0]  ;;  %v1615_v5 = vld [vmem:[#allocation2 + $0xe4] sm:$0xf] }
   0x7   :  { %1625 = vset.pattern.permute.xlu2 %v1817_v0  ;;  %77 = vperm.xlu0 %1623, %v69_v1   ;;  %v1847_v4 = vor.u32 %v1617_v3, %v1573_v2  ;;  %v1575_v6 = vld [vmem:[#allocation2 + $0xf0] sm:$0xf0]  ;;  %v1581_v7 = vld [vmem:[#allocation2 + $0xe8] sm:$0xf]  ;;  %v1618_v9 = vld [vmem:[#allocation2 + $0xf4] sm:$0xf0] }
   0x8   :  { %v1849_v8 = vor.u32 %v1615_v5, %v1575_v6  ;;  %v1616_v10 = vld [vmem:[#allocation2 + $0xec] sm:$0xf]  ;;  %v1583_v11 = vld [vmem:[#allocation2 + $0xf8] sm:$0xf0]  ;;  %v1852_v12 = vor.u32 %v1618_v9, %v1581_v7  ;;  %v1557_v14 = vld [vmem:[#allocation2 + $0xc0] sm:$0xf] }
   0x9   :  { %274 = vmatpush.bf16.msra.mxu0 %v1847_v4  ;;  %v1854_v13 = vor.u32 %v1616_v10, %v1583_v11  ;;  %v1613_v15 = vld [vmem:[#allocation2 + $0xcc] sm:$0xf0]  ;;  %v1611_v16 = vld [vmem:[#allocation2 + $0xc4] sm:$0xf]  ;;  %v1559_v18 = vld [vmem:[#allocation2 + $0xd0] sm:$0xf0] }
   0xa   :  { %287 = vmatpush.bf16.msra.mxu1 %v1849_v8  ;;  %v1857_v17 = vor.u32 %v1613_v15, %v1557_v14  ;;  %v1565_v19 = vld [vmem:[#allocation2 + $0xc8] sm:$0xf]  ;;  %v1614_v20 = vld [vmem:[#allocation2 + $0xd4] sm:$0xf0]  ;;  %300 = vmatpush.bf16.msra.mxu2 %v1852_v12  ;;  %v1861_v21 = vor.u32 %v1611_v16, %v1559_v18  ;;  %v1612_v23 = vld [vmem:[#allocation2 + $0xcc] sm:$0xf] }
   0xb   :  { %313 = vmatpush.bf16.msra.mxu3 %v1854_v13  ;;  %v1863_v22 = vor.u32 %v1614_v20, %v1565_v19  ;;  %v1567_v24 = vld [vmem:[#allocation2 + $0xd8] sm:$0xf0]  ;;  %v68_v25 = vld [vmem:[%s2439_s0] sm:$0x1]  ;;  %v1609_v28 = vld [vmem:[#allocation2 + $0xac] sm:$0xf0] }
   0xc   :  { %v1868_v26 = vor.u32 %v1612_v23, %v1567_v24  ;;  %v1541_v27 = vld [vmem:[#allocation2 + $0xa0] sm:$0xf]  ;;  %v1607_v29 = vld [vmem:[#allocation2 + $0xa4] sm:$0xf]  ;;  %v1543_v31 = vld [vmem:[#allocation2 + $0xb0] sm:$0xf0] }
   0xd   :  { %275 = vmatpush.bf16.msra.mxu0 %v1857_v17  ;;  %v1871_v30 = vor.u32 %v1609_v28, %v1541_v27  ;;  %v1549_v32 = vld [vmem:[#allocation2 + $0xa8] sm:$0xf]  ;;  %v1610_v33 = vld [vmem:[#allocation2 + $0xb4] sm:$0xf0]  ;;  %v1874_v34 = vor.u32 %v1607_v29, %v1543_v31  ;;  %v1608_v35 = vld [vmem:[#allocation2 + $0xac] sm:$0xf] }
   0xe   :  { %288 = vmatpush.bf16.msra.mxu1 %v1861_v21  ;;  %v1551_v36 = vld [vmem:[#allocation2 + $0xb8] sm:$0xf0]  ;;  %v1525_v37 = vld [vmem:[#allocation2 + $0x80] sm:$0xf]  ;;  %301 = vmatpush.bf16.msra.mxu2 %v1863_v22  ;;  %v1878_v38 = vor.u32 %v1610_v33, %v1549_v32  ;;  %v1605_v40 = vld [vmem:[#allocation2 + $0x8c] sm:$0xf0] }
   0xf   :  { %314 = vmatpush.bf16.msra.mxu3 %v1868_v26  ;;  %v1880_v39 = vor.u32 %v1608_v35, %v1551_v36  ;;  %v1603_v41 = vld [vmem:[#allocation2 + $0x84] sm:$0xf]  ;;  %v1527_v42 = vld [vmem:[#allocation2 + $0x90] sm:$0xf0]  ;;  %72 = vperm.xlu0 %1623, %v68_v25   ;;  %v1533_v43 = vld [vmem:[#allocation2 + $0x88] sm:$0xf]  ;;  %v1883_v46 = vor.u32 %v1605_v40, %v1525_v37 }
  0x10   :  { %v1606_v44 = vld [vmem:[#allocation2 + $0x94] sm:$0xf0]  ;;  %v1604_v45 = vld [vmem:[#allocation2 + $0x8c] sm:$0xf]  ;;  %v1535_v47 = vld [vmem:[#allocation2 + $0x98] sm:$0xf0]  ;;  %v1886_v48 = vor.u32 %v1603_v41, %v1527_v42 }
  0x11   :  { %276 = vmatpush.bf16.msra.mxu0 %v1871_v30  ;;  %v1509_v49 = vld [vmem:[#allocation2 + $0x60] sm:$0xf]  ;;  %v1601_v50 = vld [vmem:[#allocation2 + $0x6c] sm:$0xf0]  ;;  %v1890_v51 = vor.u32 %v1606_v44, %v1533_v43  ;;  %v1892_v52 = vor.u32 %v1604_v45, %v1535_v47  ;;  %v1599_v53 = vld [vmem:[#allocation2 + $0x64] sm:$0xf] }
  0x12   :  { %289 = vmatpush.bf16.msra.mxu1 %v1874_v34  ;;  %302 = vmatpush.bf16.msra.mxu2 %v1878_v38  ;;  %v1511_v54 = vld [vmem:[#allocation2 + $0x70] sm:$0xf0]  ;;  %v1517_v55 = vld [vmem:[#allocation2 + $0x68] sm:$0xf]  ;;  %v1602_v56 = vld [vmem:[#allocation2 + $0x74] sm:$0xf0]  ;;  %v1898_v60 = vor.u32 %v1601_v50, %v1509_v49 }
  0x13   :  { %315 = vmatpush.bf16.msra.mxu3 %v1880_v39  ;;  %v1600_v57 = vld [vmem:[#allocation2 + $0x6c] sm:$0xf]  ;;  %v1519_v58 = vld [vmem:[#allocation2 + $0x78] sm:$0xf0]  ;;  %v688_v59 = vld [vmem:[%s2439_s0 + $0xb] sm:$0x1]  ;;  %v1901_v61 = vor.u32 %v1599_v53, %v1511_v54  ;;  %v1905_v1 = vor.u32 %v1602_v56, %v1517_v55 }
  0x14   :  { %v1493_v62 = vld [vmem:[#allocation2 + $0x40] sm:$0xf]  ;;  %v1597_v63 = vld [vmem:[#allocation2 + $0x4c] sm:$0xf0]  ;;  %v1907_v2 = vor.u32 %v1600_v57, %v1519_v58  ;;  %v1595_v3 = vld [vmem:[#allocation2 + $0x44] sm:$0xf] }
  0x15   :  { %277 = vmatpush.bf16.msra.mxu0 %v1883_v46  ;;  %v1495_v5 = vld [vmem:[#allocation2 + $0x50] sm:$0xf0]  ;;  %v1501_v6 = vld [vmem:[#allocation2 + $0x48] sm:$0xf]  ;;  %v1598_v7 = vld [vmem:[#allocation2 + $0x54] sm:$0xf0]  ;;  %v1910_v11 = vor.u32 %v1597_v63, %v1493_v62 }
  0x16   :  { %290 = vmatpush.bf16.msra.mxu1 %v1886_v48  ;;  %303 = vmatpush.bf16.msra.mxu2 %v1890_v51  ;;  %v1596_v9 = vld [vmem:[#allocation2 + $0x4c] sm:$0xf]  ;;  %v1503_v10 = vld [vmem:[#allocation2 + $0x58] sm:$0xf0]  ;;  %v1913_v14 = vor.u32 %v1595_v3, %v1495_v5  ;;  %v1477_v15 = vld [vmem:[#allocation2 + $0x20] sm:$0xf]  ;;  %v1917_v18 = vor.u32 %v1598_v7, %v1501_v6 }
  0x17   :  { %316 = vmatpush.bf16.msra.mxu3 %v1892_v52  ;;  %696 = vperm.xlu0 %1623, %v688_v59   ;;  %v1593_v16 = vld [vmem:[#allocation2 + $0x2c] sm:$0xf0]  ;;  %v1919_v19 = vor.u32 %v1596_v9, %v1503_v10  ;;  %v1591_v20 = vld [vmem:[#allocation2 + $0x24] sm:$0xf]  ;;  %v1479_v23 = vld [vmem:[#allocation2 + $0x30] sm:$0xf0] }
  0x18   :  { %v1485_v24 = vld [vmem:[#allocation2 + $0x28] sm:$0xf]  ;;  %v1594_v25 = vld [vmem:[#allocation2 + $0x34] sm:$0xf0]  ;;  %v1592_v27 = vld [vmem:[#allocation2 + $0x2c] sm:$0xf]  ;;  %v1925_v31 = vor.u32 %v1593_v16, %v1477_v15  ;;  %v1928_v32 = vor.u32 %v1591_v20, %v1479_v23 }
  0x19   :  { %278 = vmatpush.bf16.msra.mxu0 %v1898_v60  ;;  %v1487_v28 = vld [vmem:[#allocation2 + $0x38] sm:$0xf0]  ;;  %v837_v29 = vld [vmem:[%s2439_s0 + $0x4] sm:$0x1]  ;;  %v1461_v33 = vld [vmem:[#allocation2] sm:$0xf]  ;;  %v1932_v36 = vor.u32 %v1594_v25, %v1485_v24 }
  0x1a   :  { %291 = vmatpush.bf16.msra.mxu1 %v1901_v61  ;;  %304 = vmatpush.bf16.msra.mxu2 %v1905_v1  ;;  %v1589_v35 = vld [vmem:[#allocation2 + $0xc] sm:$0xf0]  ;;  %v1934_v37 = vor.u32 %v1592_v27, %v1487_v28  ;;  %v1587_v40 = vld [vmem:[#allocation2 + $0x4] sm:$0xf]  ;;  %v1463_v41 = vld [vmem:[#allocation2 + $0x10] sm:$0xf0] }
  0x1b   :  { %317 = vmatpush.bf16.msra.mxu3 %v1907_v2  ;;  %v1469_v42 = vld [vmem:[#allocation2 + $0x8] sm:$0xf]  ;;  %v1590_v43 = vld [vmem:[#allocation2 + $0x14] sm:$0xf0]  ;;  %v1588_v44 = vld [vmem:[#allocation2 + $0xc] sm:$0xf]  ;;  %v1937_v47 = vor.u32 %v1589_v35, %v1461_v33  ;;  %v1940_v49 = vor.u32 %v1587_v40, %v1463_v41 }
  0x1c   :  { %v1471_v45 = vld [vmem:[#allocation2 + $0x18] sm:$0xf0]  ;;  %v1944_v50 = vor.u32 %v1590_v43, %v1469_v42  ;;  %v1138_v54 = vld [vmem:[%s2439_s0 + $0xe] sm:$0x1]  ;;  %v1287_v55 = vld [vmem:[%s2439_s0 + $0x7] sm:$0x1] }
  0x1d   :  { %279 = vmatpush.bf16.msra.mxu0 %v1910_v11  ;;  %v1946_v53 = vor.u32 %v1588_v44, %v1471_v45  ;;  %v63_v57 = vld [vmem:[%s2441_s2] ss:$4 sm:$0xf]  ;;  %v386_v58 = vld [vmem:[%s2439_s0 + $0x1] sm:$0x1]  ;;  %vm1445_vm1 = vcmask 1041408  }
  0x1e   :  { %292 = vmatpush.bf16.msra.mxu1 %v1913_v14  ;;  %305 = vmatpush.bf16.msra.mxu2 %v1917_v18  ;;  %v2035_v59 = vperm.slane %v63_v57, 0  ;;  %v2037_v62 = vperm.slane %v63_v57, 1  ;;  %v1458_v63 = vld [vmem:[%s2441_s2 + $0x1] ss:$4 sm:$0xf]  ;;  %v2053_v20 = vperm.slane %v63_v57, 2 }
  0x1f   :  { %318 = vmatpush.bf16.msra.mxu3 %v1919_v19  ;;  %841 = vperm.xlu0 %1623, %v837_v29   ;;  %v2043_v6 = vperm.slane %v1458_v63, 0  ;;  %v687_v7 = vld [vmem:[%s2439_s0 + $0x3] sm:$0x1]  ;;  %v2049_v10 = vperm.slane %v1458_v63, 1  ;;  %v2055_v23 = vperm.slane %v63_v57, 3  ;;  %v2060_v40 = vperm.slane %v1458_v63, 2 }
  0x20   :  { %2452 = vst [vmem:[#allocation5_spill] sm:$0xff] %v2053_v20  ;;  %v2063_v44 = vperm.slane %v1458_v63, 3  ;;  %v988_v57 = vld [vmem:[%s2439_s0 + $0xd] sm:$0x1]  ;;  %vm1451_vm2 = vcmask 1024  }
  0x21   :  { %280 = vmatpush.bf16.msra.mxu0 %v1925_v31 }
  0x22   :  { %293 = vmatpush.bf16.msra.mxu1 %v1928_v32  ;;  %306 = vmatpush.bf16.msra.mxu2 %v1932_v36  ;;  %2453 = vst [vmem:[#allocation6_spill] sm:$0xff] %v2063_v44 }
  0x23   :  { %319 = vmatpush.bf16.msra.mxu3 %v1934_v37 }
  0x25   :  { %281 = vmatpush.bf16.msra.mxu0 %v1937_v47 }
  0x26   :  { %294 = vmatpush.bf16.msra.mxu1 %v1940_v49  ;;  %307 = vmatpush.bf16.msra.mxu2 %v1944_v50 }
  0x27   :  { %320 = vmatpush.bf16.msra.mxu3 %v1946_v53  ;;  %1146 = vperm.xlu0 %1623, %v1138_v54  }
  0x28   :  { %282 = vmatmul.bf16.vlgmr.msra.gmra.mxu0 %v1817_v0 }
  0x29   :  { %425 = vmatpush.bf16.msrb.mxu0 %v1847_v4  ;;  %295 = vmatmul.bf16.vlgmr.msra.gmra.mxu1 %v1817_v0 }
  0x2a   :  { %451 = vmatpush.bf16.msrb.mxu2 %v1852_v12  ;;  %321 = vmatmul.bf16.vlgmr.msra.gmra.mxu3 %v1817_v0 }
  0x2b   :  { %308 = vmatmul.bf16.vlgmr.msra.gmra.mxu2 %v1817_v0  ;;  %438 = vmatpush.bf16.msrb.mxu1 %v1849_v8  ;;  %v387_v0 = vld [vmem:[%s2439_s0 + $0x9] sm:$0x1] }
  0x2c   :  { %464 = vmatpush.bf16.msrb.mxu3 %v1854_v13  ;;  %395 = vperm.xlu1 %1624, %v387_v0  }
  0x2d   :  { %426 = vmatpush.bf16.msrb.mxu0 %v1857_v17 }
  0x2e   :  { %452 = vmatpush.bf16.msrb.mxu2 %v1863_v22 }
  0x2f   :  { %439 = vmatpush.bf16.msrb.mxu1 %v1861_v21  ;;  %1291 = vperm.xlu0 %1623, %v1287_v55  }
  0x30   :  { %465 = vmatpush.bf16.msrb.mxu3 %v1868_v26 }
  0x31   :  { %427 = vmatpush.bf16.msrb.mxu0 %v1871_v30 }
  0x32   :  { %453 = vmatpush.bf16.msrb.mxu2 %v1878_v38 }
  0x33   :  { %440 = vmatpush.bf16.msrb.mxu1 %v1874_v34 }
  0x34   :  { %466 = vmatpush.bf16.msrb.mxu3 %v1880_v39  ;;  %390 = vperm.xlu1 %1624, %v386_v58  }
  0x35   :  { %428 = vmatpush.bf16.msrb.mxu0 %v1883_v46 }
  0x36   :  { %454 = vmatpush.bf16.msrb.mxu2 %v1890_v51 }
  0x37   :  { %441 = vmatpush.bf16.msrb.mxu1 %v1886_v48 }
  0x38   :  { %467 = vmatpush.bf16.msrb.mxu3 %v1892_v52 }
  0x39   :  { %429 = vmatpush.bf16.msrb.mxu0 %v1898_v60 }
  0x3a   :  { %455 = vmatpush.bf16.msrb.mxu2 %v1905_v1 }
  0x3b   :  { %442 = vmatpush.bf16.msrb.mxu1 %v1901_v61 }
  0x3c   :  { %468 = vmatpush.bf16.msrb.mxu3 %v1907_v2  ;;  %691 = vperm.xlu1 %1624, %v687_v7  }
  0x3d   :  { %430 = vmatpush.bf16.msrb.mxu0 %v1910_v11 }
  0x3e   :  { %456 = vmatpush.bf16.msrb.mxu2 %v1917_v18 }
  0x3f   :  { %443 = vmatpush.bf16.msrb.mxu1 %v1913_v14 }
  0x40   :  { %469 = vmatpush.bf16.msrb.mxu3 %v1919_v19 }
  0x41   :  { %431 = vmatpush.bf16.msrb.mxu0 %v1925_v31 }
  0x42   :  { %457 = vmatpush.bf16.msrb.mxu2 %v1932_v36 }
  0x43   :  { %444 = vmatpush.bf16.msrb.mxu1 %v1928_v32 }
  0x44   :  { %470 = vmatpush.bf16.msrb.mxu3 %v1934_v37  ;;  %996 = vperm.xlu1 %1624, %v988_v57  }
  0x45   :  { %432 = vmatpush.bf16.msrb.mxu0 %v1937_v47 }
  0x46   :  { %458 = vmatpush.bf16.msrb.mxu2 %v1944_v50 }
  0x47   :  { %445 = vmatpush.bf16.msrb.mxu1 %v1940_v49 }
  0x48   :  { %471 = vmatpush.bf16.msrb.mxu3 %v1946_v53 }
  0x49   :  { %575 = vmatpush.bf16.msra.mxu0 %v1847_v4 }
  0x4a   :  { %601 = vmatpush.bf16.msra.mxu2 %v1852_v12 }
  0x4b   :  { %588 = vmatpush.bf16.msra.mxu1 %v1849_v8 }
  0x4c   :  { %614 = vmatpush.bf16.msra.mxu3 %v1854_v13 }
  0x4d   :  { %576 = vmatpush.bf16.msra.mxu0 %v1857_v17 }
  0x4e   :  { %602 = vmatpush.bf16.msra.mxu2 %v1863_v22 }
  0x4f   :  { %589 = vmatpush.bf16.msra.mxu1 %v1861_v21 }
  0x50   :  { %615 = vmatpush.bf16.msra.mxu3 %v1868_v26 }
  0x51   :  { %577 = vmatpush.bf16.msra.mxu0 %v1871_v30 }
  0x52   :  { %603 = vmatpush.bf16.msra.mxu2 %v1878_v38 }
  0x53   :  { %590 = vmatpush.bf16.msra.mxu1 %v1874_v34 }
  0x54   :  { %616 = vmatpush.bf16.msra.mxu3 %v1880_v39 }
  0x55   :  { %578 = vmatpush.bf16.msra.mxu0 %v1883_v46 }
  0x56   :  { %604 = vmatpush.bf16.msra.mxu2 %v1890_v51 }
  0x57   :  { %591 = vmatpush.bf16.msra.mxu1 %v1886_v48 }
  0x58   :  { %617 = vmatpush.bf16.msra.mxu3 %v1892_v52 }
  0x59   :  { %579 = vmatpush.bf16.msra.mxu0 %v1898_v60 }
  0x5a   :  { %605 = vmatpush.bf16.msra.mxu2 %v1905_v1 }
  0x5b   :  { %592 = vmatpush.bf16.msra.mxu1 %v1901_v61 }
  0x5c   :  { %618 = vmatpush.bf16.msra.mxu3 %v1907_v2 }
  0x5d   :  { %580 = vmatpush.bf16.msra.mxu0 %v1910_v11 }
  0x5e   :  { %606 = vmatpush.bf16.msra.mxu2 %v1917_v18 }
  0x5f   :  { %593 = vmatpush.bf16.msra.mxu1 %v1913_v14 }
  0x60   :  { %619 = vmatpush.bf16.msra.mxu3 %v1919_v19 }
  0x61   :  { %581 = vmatpush.bf16.msra.mxu0 %v1925_v31 }
  0x62   :  { %607 = vmatpush.bf16.msra.mxu2 %v1932_v36 }
  0x63   :  { %594 = vmatpush.bf16.msra.mxu1 %v1928_v32 }
  0x64   :  { %620 = vmatpush.bf16.msra.mxu3 %v1934_v37 }
  0x65   :  { %582 = vmatpush.bf16.msra.mxu0 %v1937_v47 }
  0x66   :  { %608 = vmatpush.bf16.msra.mxu2 %v1944_v50 }
  0x67   :  { %595 = vmatpush.bf16.msra.mxu1 %v1940_v49 }
  0x68   :  { %621 = vmatpush.bf16.msra.mxu3 %v1946_v53 }
  0x79   :  { %v78_v56 = vpop.permute.xlu0 %77 }
  0x7a   :  { %v93_v15 = vmul.f32 %v2035_v59, %v78_v56  ;;  %v94_v16 = vmul.f32 %v2037_v62, %v78_v56  ;;  %v95_v58 = vmul.f32 %v2053_v20, %v78_v56 }
  0x7c   :  { %v110_v28 = vadd.f32 %v2043_v6, %v93_v15  ;;  %v111_v41 = vadd.f32 %v2049_v10, %v94_v16 }
  0x81   :  { %v73_v3 = vpop.permute.xlu0 %72 }
  0x82   :  { %v89_v5 = vmul.f32 %v2035_v59, %v73_v3  ;;  %v90_v9 = vmul.f32 %v2037_v62, %v73_v3  ;;  %v91_v55 = vmul.f32 %v2053_v20, %v73_v3  ;;  %v92_v0 = vmul.f32 %v2055_v23, %v73_v3 }
  0x84   :  { %v106_v24 = vadd.f32 %v2043_v6, %v89_v5  ;;  %v107_v27 = vadd.f32 %v2049_v10, %v90_v9  ;;  %v96_v5 = vmul.f32 %v2055_v23, %v78_v56  ;;  %v108_v16 = vadd.f32 %v2060_v40, %v91_v55 }
  0x85   :  { %v109_v3 = vadd.f32 %v2063_v44, %v92_v0 }
  0xa5   :  { %v283_v25 = vpop.f32.mrf.mxu0 }
  0xa6   :  { %v330_v29 = vrot.slane %v283_v25, 1  ;;  %v342_v33 = vadd.f32 %v283_v25, %v106_v24  ;;  %v296_v35 = vpop.f32.mrf.mxu1  ;;  %v112_v24 = vadd.f32 %v2060_v40, %v95_v58  ;;  %v1137_v58 = vld [vmem:[%s2439_s0 + $0x6] sm:$0x1] }
  0xa7   :  { %v331_v42 = vrot.slane %v296_v35, 1  ;;  %v343_v43 = vadd.f32 %v296_v35, %v107_v27  ;;  %v113_v27 = vadd.f32 %v2063_v44, %v96_v5  ;;  %1141 = vperm.xlu1 %1624, %v1137_v58  }
  0xa8   :  { %v346_v45 = vadd.f32 %v330_v29, %v110_v28  ;;  %v350_v54 = vmul.f32 0.5, %v342_v33 }
  0xa9   :  { %v347_v7 = vadd.f32 %v331_v42, %v111_v41  ;;  %v351_v9 = vmul.f32 0.5, %v343_v43 }
  0xaa   :  { %v353_v15 = vmul.f32 0.5, %v346_v45  ;;  %1628 = vtanh.f32 %v350_v54 }
  0xab   :  { %v354_v63 = vmul.f32 0.5, %v347_v7  ;;  %1630 = vtanh.f32 %v351_v9 }
  0xac   :  { %1632 = vtanh.f32 %v353_v15 }
  0xad   :  { %1634 = vtanh.f32 %v354_v63  ;;  %v322_v28 = vpop.f32.mrf.mxu3  ;;  %v285_v41 = vpop.f32.mrf.mxu0 }
  0xae   :  { %v309_v25 = vpop.f32.mrf.mxu2  ;;  %v333_v33 = vrot.slane %v322_v28, 1  ;;  %v345_v35 = vadd.f32 %v322_v28, %v109_v3  ;;  %v298_v42 = vpop.f32.mrf.mxu1 }
  0xaf   :  { %v332_v56 = vrot.slane %v309_v25, 1  ;;  %v344_v29 = vadd.f32 %v309_v25, %v108_v16 }
  0xb0   :  { %v1629_v43 = vpop.eup %1628  ;;  %v349_v57 = vadd.f32 %v333_v33, %v113_v27  ;;  %1636 = vtanh.f32 %v345_v35 }
  0xb1   :  { %v348_v45 = vadd.f32 %v332_v56, %v112_v24  ;;  %v352_v54 = vmul.f32 0.5, %v344_v29  ;;  %v1631_v55 = vpop.eup %1630  ;;  %v362_v0 = vmul.f32 0.5, %v1629_v43 }
  0xb2   :  { %v1633_v7 = vpop.eup %1632  ;;  %v363_v5 = vmul.f32 0.5, %v1631_v55  ;;  %1638 = vtanh.f32 %v349_v57 }
  0xb3   :  { %v355_v9 = vmul.f32 0.5, %v348_v45  ;;  %v1635_v15 = vpop.eup %1634  ;;  %v365_v63 = vmul.f32 0.5, %v1633_v7  ;;  %v368_v16 = vadd.f32 0.5, %v362_v0  ;;  %1640 = vtanh.f32 %v352_v54 }
  0xb4   :  { %v366_v3 = vmul.f32 0.5, %v1635_v15  ;;  %v369_v25 = vadd.f32 0.5, %v363_v5 }
  0xb5   :  { %v324_v27 = vpop.f32.mrf.mxu3  ;;  %v371_v56 = vadd.f32 0.5, %v365_v63  ;;  %1642 = vtanh.f32 %v355_v9 }
  0xb6   :  { %v311_v24 = vpop.f32.mrf.mxu2  ;;  %v1637_v28 = vpop.eup %1636  ;;  %v372_v29 = vadd.f32 0.5, %v366_v3  ;;  %v376_v33 = vmul.f32 0.0, %v369_v25 }
  0xb7   :  { %v378_v35 = vmul.f32 %v1637_v28, %v368_v16 }
  0xb8   :  { %v377_v41 = vmul.f32 0.0, %v372_v29  ;;  %v1639_v42 = vpop.eup %1638 }
  0xb9   :  { %v2079_v43 = vadd.f32 %v378_v35, %v376_v33  ;;  %v1641_v45 = vpop.eup %1640  ;;  %v379_v55 = vmul.f32 %v1639_v42, %v371_v56  ;;  %v396_v33 = vpop.permute.xlu1 %395  ;;  %v538_v35 = vld [vmem:[%s2439_s0 + $0xa] sm:$0x1] }
  0xba   :  { %v364_v54 = vmul.f32 0.5, %v1641_v45  ;;  %546 = vperm.xlu2 %1625, %v538_v35  }
  0xbb   :  { %1644 = vtanh.f32 %v2079_v43  ;;  %v1643_v57 = vpop.eup %1642  ;;  %v2082_v0 = vadd.f32 %v379_v55, %v377_v41  ;;  %v402_v55 = vmul.f32 %v396_v33, %v2035_v59 }
  0xbc   :  { %v367_v58 = vmul.f32 0.5, %v1643_v57  ;;  %v370_v5 = vadd.f32 0.5, %v364_v54  ;;  %v403_v57 = vmul.f32 %v396_v33, %v2037_v62 }
  0xbd   :  { %1646 = vtanh.f32 %v2082_v0 }
  0xbe   :  { %v373_v15 = vadd.f32 0.5, %v367_v58 }
  0xc1   :  { %v1645_v7 = vpop.eup %1644  ;;  %v391_v41 = vpop.permute.xlu1 %390 }
  0xc2   :  { %v384_v9 = vmul.f32 %v1645_v7, %v370_v5  ;;  %v398_v42 = vmul.f32 %v391_v41, %v2035_v59  ;;  %v399_v45 = vmul.f32 %v391_v41, %v2037_v62  ;;  %v410_v7 = vadd.f32 %v402_v55, %v2043_v6 }
  0xc3   :  { %v1647_v63 = vpop.eup %1646 }
  0xc4   :  { %v385_v16 = vmul.f32 %v1647_v63, %v373_v15  ;;  %v414_v3 = vpack.c.bf16 %v384_v9, %v384_v9  ;;  %v406_v54 = vadd.f32 %v398_v42, %v2043_v6  ;;  %v407_v58 = vadd.f32 %v399_v45, %v2049_v10 }
  0xc5   :  { %v411_v15 = vadd.f32 %v403_v57, %v2049_v10 }
  0xc6   :  { %v415_v25 = vpack.c.bf16 %v385_v16, %v385_v16  ;;  %v418_v27 = vunpack.c.l.b16 %v414_v3 }
  0xc8   :  { %v419_v24 = vunpack.c.l.b16 %v415_v25 }
  0xca   :  { %v420_v28 = vrot.slane %v419_v24, 7  ;;  %v404_v24 = vmul.f32 %v396_v33, %v2053_v20 }
  0xcc   :  { %v422_v56 = vsel %vm421_vm0, %v420_v28, %v418_v27  ;;  %v405_v27 = vmul.f32 %v396_v33, %v2055_v23  ;;  %v400_v28 = vmul.f32 %v391_v41, %v2053_v20 }
  0xcd   :  { %v423_v29 = vpack.c.b16 %v422_v56, %v422_v56  ;;  %v401_v56 = vmul.f32 %v391_v41, %v2055_v23 }
  0xcf   :  { %433 = vmatmul.bf16.vlgmr.msrb.gmra.mxu0 %v423_v29  ;;  %446 = vmatmul.bf16.vlgmr.msrb.gmra.mxu1 %v423_v29  ;;  %v409_v33 = vadd.f32 %v401_v56, %v2063_v44 }
  0xd0   :  { %459 = vmatmul.bf16.vlgmr.msrb.gmra.mxu2 %v423_v29  ;;  %472 = vmatmul.bf16.vlgmr.msrb.gmra.mxu3 %v423_v29 }
  0xd1   :  { %725 = vmatpush.bf16.msrb.mxu0 %v1847_v4  ;;  %738 = vmatpush.bf16.msrb.mxu1 %v1849_v8 }
  0xd2   :  { %751 = vmatpush.bf16.msrb.mxu2 %v1852_v12  ;;  %764 = vmatpush.bf16.msrb.mxu3 %v1854_v13 }
  0xd5   :  { %726 = vmatpush.bf16.msrb.mxu0 %v1857_v17  ;;  %739 = vmatpush.bf16.msrb.mxu1 %v1861_v21 }
  0xd6   :  { %752 = vmatpush.bf16.msrb.mxu2 %v1863_v22  ;;  %765 = vmatpush.bf16.msrb.mxu3 %v1868_v26 }
  0xd9   :  { %727 = vmatpush.bf16.msrb.mxu0 %v1871_v30  ;;  %740 = vmatpush.bf16.msrb.mxu1 %v1874_v34 }
  0xda   :  { %753 = vmatpush.bf16.msrb.mxu2 %v1878_v38  ;;  %766 = vmatpush.bf16.msrb.mxu3 %v1880_v39 }
  0xdd   :  { %728 = vmatpush.bf16.msrb.mxu0 %v1883_v46  ;;  %741 = vmatpush.bf16.msrb.mxu1 %v1886_v48 }
  0xde   :  { %754 = vmatpush.bf16.msrb.mxu2 %v1890_v51  ;;  %767 = vmatpush.bf16.msrb.mxu3 %v1892_v52 }
  0xe1   :  { %729 = vmatpush.bf16.msrb.mxu0 %v1898_v60  ;;  %742 = vmatpush.bf16.msrb.mxu1 %v1901_v61 }
  0xe2   :  { %755 = vmatpush.bf16.msrb.mxu2 %v1905_v1  ;;  %768 = vmatpush.bf16.msrb.mxu3 %v1907_v2 }
  0xe5   :  { %730 = vmatpush.bf16.msrb.mxu0 %v1910_v11  ;;  %743 = vmatpush.bf16.msrb.mxu1 %v1913_v14 }
  0xe6   :  { %756 = vmatpush.bf16.msrb.mxu2 %v1917_v18  ;;  %769 = vmatpush.bf16.msrb.mxu3 %v1919_v19 }
  0xe9   :  { %731 = vmatpush.bf16.msrb.mxu0 %v1925_v31  ;;  %744 = vmatpush.bf16.msrb.mxu1 %v1928_v32 }
  0xea   :  { %757 = vmatpush.bf16.msrb.mxu2 %v1932_v36  ;;  %770 = vmatpush.bf16.msrb.mxu3 %v1934_v37 }
  0xed   :  { %732 = vmatpush.bf16.msrb.mxu0 %v1937_v47  ;;  %745 = vmatpush.bf16.msrb.mxu1 %v1940_v49 }
  0xee   :  { %758 = vmatpush.bf16.msrb.mxu2 %v1944_v50  ;;  %771 = vmatpush.bf16.msrb.mxu3 %v1946_v53 }
 0x14c   :  { %v434_v5 = vpop.f32.mrf.mxu0  ;;  %v447_v9 = vpop.f32.mrf.mxu1 }
 0x14d   :  { %v481_v63 = vrot.slane %v434_v5, 1  ;;  %v493_v16 = vadd.f32 %v434_v5, %v406_v54  ;;  %v482_v3 = vrot.slane %v447_v9, 1  ;;  %v494_v25 = vadd.f32 %v447_v9, %v407_v58 }
 0x14e   :  { %v408_v54 = vadd.f32 %v400_v28, %v2060_v40  ;;  %v412_v58 = vadd.f32 %v404_v24, %v2060_v40  ;;  %v413_v9 = vadd.f32 %v405_v27, %v2063_v44  ;;  %v537_v24 = vld [vmem:[%s2439_s0 + $0x2] sm:$0x1] }
 0x14f   :  { %v497_v29 = vadd.f32 %v481_v63, %v410_v7  ;;  %v501_v35 = vmul.f32 0.5, %v493_v16  ;;  %v498_v42 = vadd.f32 %v482_v3, %v411_v15  ;;  %v502_v45 = vmul.f32 0.5, %v494_v25  ;;  %541 = vperm.xlu2 %1625, %v537_v24  }
 0x151   :  { %v504_v55 = vmul.f32 0.5, %v497_v29  ;;  %1648 = vtanh.f32 %v501_v35  ;;  %v505_v57 = vmul.f32 0.5, %v498_v42 }
 0x152   :  { %1650 = vtanh.f32 %v502_v45 }
 0x153   :  { %1652 = vtanh.f32 %v504_v55  ;;  %v460_v5 = vpop.f32.mrf.mxu2  ;;  %v473_v20 = vpop.f32.mrf.mxu3 }
 0x154   :  { %1654 = vtanh.f32 %v505_v57  ;;  %v483_v41 = vrot.slane %v460_v5, 1  ;;  %v495_v7 = vadd.f32 %v460_v5, %v408_v54  ;;  %v484_v15 = vrot.slane %v473_v20, 1  ;;  %v436_v63 = vpop.f32.mrf.mxu0  ;;  %v449_v16 = vpop.f32.mrf.mxu1 }
 0x155   :  { %v496_v3 = vadd.f32 %v473_v20, %v409_v33  ;;  %v838_v16 = vld [vmem:[%s2439_s0 + $0xc] sm:$0x1] }
 0x156   :  { %v499_v25 = vadd.f32 %v483_v41, %v412_v58  ;;  %v503_v29 = vmul.f32 0.5, %v495_v7  ;;  %v500_v35 = vadd.f32 %v484_v15, %v413_v9 }
 0x157   :  { %v1649_v28 = vpop.eup %1648  ;;  %1656 = vtanh.f32 %v496_v3  ;;  %846 = vperm.xlu2 %1625, %v838_v16  }
 0x158   :  { %v1651_v56 = vpop.eup %1650  ;;  %v513_v42 = vmul.f32 0.5, %v1649_v28  ;;  %v506_v27 = vmul.f32 0.5, %v499_v25  ;;  %1658 = vtanh.f32 %v500_v35 }
 0x159   :  { %v1653_v45 = vpop.eup %1652  ;;  %v514_v55 = vmul.f32 0.5, %v1651_v56  ;;  %1660 = vtanh.f32 %v503_v29 }
 0x15a   :  { %v1655_v57 = vpop.eup %1654  ;;  %v516_v54 = vmul.f32 0.5, %v1653_v45  ;;  %v519_v5 = vadd.f32 0.5, %v513_v42  ;;  %1662 = vtanh.f32 %v506_v27  ;;  %v987_v45 = vld [vmem:[%s2439_s0 + $0x5] sm:$0x1] }
 0x15b   :  { %v517_v20 = vmul.f32 0.5, %v1655_v57  ;;  %v520_v58 = vadd.f32 0.5, %v514_v55  ;;  %v462_v33 = vpop.f32.mrf.mxu2  ;;  %v475_v9 = vpop.f32.mrf.mxu3 }
 0x15c   :  { %v522_v41 = vadd.f32 0.5, %v516_v54  ;;  %v1288_v9 = vld [vmem:[%s2439_s0 + $0xf] sm:$0x1] }
 0x15d   :  { %v1657_v7 = vpop.eup %1656  ;;  %v523_v15 = vadd.f32 0.5, %v517_v20  ;;  %v527_v63 = vmul.f32 %v520_v58, %v2079_v43 }
 0x15e   :  { %v529_v3 = vmul.f32 %v1657_v7, %v519_v5  ;;  %v1659_v25 = vpop.eup %1658 }
 0x15f   :  { %v528_v35 = vmul.f32 %v523_v15, %v2082_v0  ;;  %v1661_v28 = vpop.eup %1660  ;;  %v530_v29 = vmul.f32 %v1659_v25, %v522_v41  ;;  %991 = vperm.xlu2 %1625, %v987_v45  }
 0x160   :  { %v2145_v24 = vadd.f32 %v529_v3, %v527_v63  ;;  %v1663_v56 = vpop.eup %1662  ;;  %v515_v27 = vmul.f32 0.5, %v1661_v28  ;;  %v547_v3 = vpop.permute.xlu2 %546 }
 0x161   :  { %v2147_v42 = vadd.f32 %v530_v29, %v528_v35  ;;  %v518_v43 = vmul.f32 0.5, %v1663_v56  ;;  %v553_v29 = vmul.f32 %v547_v3, %v2035_v59  ;;  %v554_v56 = vmul.f32 %v547_v3, %v2037_v62 }
 0x162   :  { %1664 = vtanh.f32 %v2145_v24  ;;  %v521_v55 = vadd.f32 0.5, %v515_v27 }
 0x163   :  { %1666 = vtanh.f32 %v2147_v42  ;;  %v524_v57 = vadd.f32 0.5, %v518_v43  ;;  %v561_v45 = vadd.f32 %v553_v29, %v2043_v6 }
 0x167   :  { %1296 = vperm.xlu2 %1625, %v1288_v9  }
 0x168   :  { %v1665_v0 = vpop.eup %1664 }
 0x169   :  { %v535_v54 = vmul.f32 %v1665_v0, %v521_v55  ;;  %v1667_v5 = vpop.eup %1666  ;;  %v562_v0 = vadd.f32 %v554_v56, %v2049_v10 }
 0x16a   :  { %v536_v20 = vmul.f32 %v1667_v5, %v524_v57 }
 0x16b   :  { %v565_v58 = vpack.c.bf16 %v535_v54, %v535_v54 }
 0x16c   :  { %v566_v33 = vpack.c.bf16 %v536_v20, %v536_v20 }
 0x16d   :  { %v569_v7 = vunpack.c.l.b16 %v565_v58 }
 0x16e   :  { %v570_v41 = vunpack.c.l.b16 %v566_v33  ;;  %v2454_v33 = vld [vmem:[#allocation5_spill] sm:$0xff] }
 0x16f   :  { %v555_v9 = vmul.f32 %v547_v3, %v2454_v33 }
 0x170   :  { %v571_v15 = vrot.slane %v570_v41, 7  ;;  %v556_v41 = vmul.f32 %v547_v3, %v2055_v23 }
 0x172   :  { %v572_v63 = vsel %vm421_vm0, %v571_v15, %v569_v7 }
 0x173   :  { %v573_v16 = vpack.c.b16 %v572_v63, %v572_v63 }
 0x175   :  { %583 = vmatmul.bf16.vlgmr.msra.gmra.mxu0 %v573_v16  ;;  %596 = vmatmul.bf16.vlgmr.msra.gmra.mxu1 %v573_v16 }
 0x176   :  { %609 = vmatmul.bf16.vlgmr.msra.gmra.mxu2 %v573_v16  ;;  %622 = vmatmul.bf16.vlgmr.msra.gmra.mxu3 %v573_v16 }
 0x177   :  { %875 = vmatpush.bf16.msra.mxu0 %v1847_v4  ;;  %888 = vmatpush.bf16.msra.mxu1 %v1849_v8 }
 0x178   :  { %901 = vmatpush.bf16.msra.mxu2 %v1852_v12  ;;  %914 = vmatpush.bf16.msra.mxu3 %v1854_v13 }
 0x17b   :  { %876 = vmatpush.bf16.msra.mxu0 %v1857_v17  ;;  %889 = vmatpush.bf16.msra.mxu1 %v1861_v21 }
 0x17c   :  { %902 = vmatpush.bf16.msra.mxu2 %v1863_v22  ;;  %915 = vmatpush.bf16.msra.mxu3 %v1868_v26 }
 0x17f   :  { %877 = vmatpush.bf16.msra.mxu0 %v1871_v30  ;;  %890 = vmatpush.bf16.msra.mxu1 %v1874_v34 }
 0x180   :  { %903 = vmatpush.bf16.msra.mxu2 %v1878_v38  ;;  %916 = vmatpush.bf16.msra.mxu3 %v1880_v39 }
 0x183   :  { %878 = vmatpush.bf16.msra.mxu0 %v1883_v46  ;;  %891 = vmatpush.bf16.msra.mxu1 %v1886_v48 }
 0x184   :  { %904 = vmatpush.bf16.msra.mxu2 %v1890_v51  ;;  %917 = vmatpush.bf16.msra.mxu3 %v1892_v52 }
 0x187   :  { %879 = vmatpush.bf16.msra.mxu0 %v1898_v60  ;;  %892 = vmatpush.bf16.msra.mxu1 %v1901_v61 }
 0x188   :  { %905 = vmatpush.bf16.msra.mxu2 %v1905_v1  ;;  %918 = vmatpush.bf16.msra.mxu3 %v1907_v2 }
 0x18b   :  { %880 = vmatpush.bf16.msra.mxu0 %v1910_v11  ;;  %893 = vmatpush.bf16.msra.mxu1 %v1913_v14 }
 0x18c   :  { %906 = vmatpush.bf16.msra.mxu2 %v1917_v18  ;;  %919 = vmatpush.bf16.msra.mxu3 %v1919_v19 }
 0x18f   :  { %881 = vmatpush.bf16.msra.mxu0 %v1925_v31  ;;  %894 = vmatpush.bf16.msra.mxu1 %v1928_v32 }
 0x190   :  { %907 = vmatpush.bf16.msra.mxu2 %v1932_v36  ;;  %920 = vmatpush.bf16.msra.mxu3 %v1934_v37 }
 0x193   :  { %882 = vmatpush.bf16.msra.mxu0 %v1937_v47  ;;  %895 = vmatpush.bf16.msra.mxu1 %v1940_v49 }
 0x194   :  { %908 = vmatpush.bf16.msra.mxu2 %v1944_v50  ;;  %921 = vmatpush.bf16.msra.mxu3 %v1946_v53 }
 0x1a9   :  { %v542_v25 = vpop.permute.xlu2 %541 }
 0x1aa   :  { %v549_v35 = vmul.f32 %v542_v25, %v2035_v59  ;;  %v550_v28 = vmul.f32 %v542_v25, %v2037_v62  ;;  %v551_v7 = vmul.f32 %v542_v25, %v2454_v33  ;;  %v552_v15 = vmul.f32 %v542_v25, %v2055_v23 }
 0x1ac   :  { %v557_v27 = vadd.f32 %v549_v35, %v2043_v6  ;;  %v558_v43 = vadd.f32 %v550_v28, %v2049_v10  ;;  %v560_v3 = vadd.f32 %v552_v15, %v2063_v44 }
 0x1f2   :  { %v584_v55 = vpop.f32.mrf.mxu0  ;;  %v597_v57 = vpop.f32.mrf.mxu1 }
 0x1f3   :  { %v631_v54 = vrot.slane %v584_v55, 1  ;;  %v643_v5 = vadd.f32 %v584_v55, %v557_v27  ;;  %v632_v20 = vrot.slane %v597_v57, 1  ;;  %v644_v58 = vadd.f32 %v597_v57, %v558_v43 }
 0x1f4   :  { %v559_v27 = vadd.f32 %v551_v7, %v2060_v40  ;;  %v563_v43 = vadd.f32 %v555_v9, %v2060_v40  ;;  %v564_v57 = vadd.f32 %v556_v41, %v2063_v44 }
 0x1f5   :  { %v647_v63 = vadd.f32 %v631_v54, %v561_v45  ;;  %v651_v16 = vmul.f32 0.5, %v643_v5  ;;  %v648_v35 = vadd.f32 %v632_v20, %v562_v0  ;;  %v652_v28 = vmul.f32 0.5, %v644_v58 }
 0x1f7   :  { %v654_v29 = vmul.f32 0.5, %v647_v63  ;;  %1668 = vtanh.f32 %v651_v16  ;;  %v655_v56 = vmul.f32 0.5, %v648_v35 }
 0x1f8   :  { %1670 = vtanh.f32 %v652_v28 }
 0x1f9   :  { %1672 = vtanh.f32 %v654_v29  ;;  %v610_v55 = vpop.f32.mrf.mxu2  ;;  %v623_v33 = vpop.f32.mrf.mxu3 }
 0x1fa   :  { %1674 = vtanh.f32 %v655_v56  ;;  %v633_v25 = vrot.slane %v610_v55, 1  ;;  %v645_v45 = vadd.f32 %v610_v55, %v559_v27  ;;  %v634_v0 = vrot.slane %v623_v33, 1  ;;  %v586_v54 = vpop.f32.mrf.mxu0  ;;  %v599_v5 = vpop.f32.mrf.mxu1 }
 0x1fb   :  { %v646_v20 = vadd.f32 %v623_v33, %v560_v3 }
 0x1fc   :  { %v649_v58 = vadd.f32 %v633_v25, %v563_v43  ;;  %v653_v63 = vmul.f32 0.5, %v645_v45  ;;  %v650_v16 = vadd.f32 %v634_v0, %v564_v57 }
 0x1fd   :  { %v1669_v7 = vpop.eup %1668  ;;  %1676 = vtanh.f32 %v646_v20 }
 0x1fe   :  { %v1671_v35 = vpop.eup %1670  ;;  %v663_v9 = vmul.f32 0.5, %v1669_v7  ;;  %v656_v28 = vmul.f32 0.5, %v649_v58  ;;  %1678 = vtanh.f32 %v650_v16 }
 0x1ff   :  { %v1673_v29 = vpop.eup %1672  ;;  %v664_v15 = vmul.f32 0.5, %v1671_v35  ;;  %1680 = vtanh.f32 %v653_v63 }
 0x200   :  { %v1675_v41 = vpop.eup %1674  ;;  %v666_v44 = vmul.f32 0.5, %v1673_v29  ;;  %v669_v56 = vadd.f32 0.5, %v663_v9  ;;  %1682 = vtanh.f32 %v656_v28 }
 0x201   :  { %v667_v27 = vmul.f32 0.5, %v1675_v41  ;;  %v670_v55 = vadd.f32 0.5, %v664_v15  ;;  %v612_v54 = vpop.f32.mrf.mxu2  ;;  %v625_v5 = vpop.f32.mrf.mxu3 }
 0x202   :  { %v672_v33 = vadd.f32 0.5, %v666_v44 }
 0x203   :  { %v1677_v43 = vpop.eup %1676  ;;  %v673_v3 = vadd.f32 0.5, %v667_v27  ;;  %v677_v57 = vmul.f32 %v670_v55, %v2145_v24 }
 0x204   :  { %v679_v25 = vmul.f32 %v1677_v43, %v669_v56  ;;  %v1679_v45 = vpop.eup %1678  ;;  %v692_v43 = vpop.permute.xlu1 %691 }
 0x205   :  { %v678_v0 = vmul.f32 %v673_v3, %v2147_v42  ;;  %v1681_v20 = vpop.eup %1680  ;;  %v680_v58 = vmul.f32 %v1679_v45, %v672_v33  ;;  %v697_v3 = vpop.permute.xlu0 %696 }
 0x206   :  { %v2208_v16 = vadd.f32 %v679_v25, %v677_v57  ;;  %v1683_v7 = vpop.eup %1682  ;;  %v665_v35 = vmul.f32 0.5, %v1681_v20  ;;  %v699_v57 = vmul.f32 %v692_v43, %v2035_v59  ;;  %v700_v25 = vmul.f32 %v692_v43, %v2037_v62 }
 0x207   :  { %v2210_v63 = vadd.f32 %v680_v58, %v678_v0  ;;  %v668_v44 = vmul.f32 0.5, %v1683_v7  ;;  %v703_v45 = vmul.f32 %v697_v3, %v2035_v59  ;;  %v704_v0 = vmul.f32 %v697_v3, %v2037_v62 }
 0x208   :  { %1684 = vtanh.f32 %v2208_v16  ;;  %v671_v9 = vadd.f32 0.5, %v665_v35  ;;  %v707_v20 = vadd.f32 %v699_v57, %v2043_v6  ;;  %v708_v58 = vadd.f32 %v700_v25, %v2049_v10 }
 0x209   :  { %1686 = vtanh.f32 %v2210_v63  ;;  %v674_v24 = vadd.f32 0.5, %v668_v44  ;;  %v711_v7 = vadd.f32 %v703_v45, %v2043_v6  ;;  %v712_v44 = vadd.f32 %v704_v0, %v2049_v10 }
 0x20e   :  { %v1685_v28 = vpop.eup %1684 }
 0x20f   :  { %v685_v29 = vmul.f32 %v1685_v28, %v671_v9  ;;  %v1687_v15 = vpop.eup %1686 }
 0x210   :  { %v686_v41 = vmul.f32 %v1687_v15, %v674_v24 }
 0x211   :  { %v715_v42 = vpack.c.bf16 %v685_v29, %v685_v29 }
 0x212   :  { %v716_v56 = vpack.c.bf16 %v686_v41, %v686_v41  ;;  %v2455_v41 = vld [vmem:[#allocation5_spill] sm:$0xff] }
 0x213   :  { %v719_v55 = vunpack.c.l.b16 %v715_v42  ;;  %v705_v42 = vmul.f32 %v697_v3, %v2455_v41 }
 0x214   :  { %v720_v27 = vunpack.c.l.b16 %v716_v56  ;;  %v706_v56 = vmul.f32 %v697_v3, %v2055_v23 }
 0x216   :  { %v721_v54 = vrot.slane %v720_v27, 7  ;;  %v701_v27 = vmul.f32 %v692_v43, %v2455_v41 }
 0x218   :  { %v722_v5 = vsel %vm421_vm0, %v721_v54, %v719_v55  ;;  %v702_v55 = vmul.f32 %v692_v43, %v2055_v23  ;;  %v709_v0 = vadd.f32 %v701_v27, %v2060_v40 }
 0x219   :  { %v723_v33 = vpack.c.b16 %v722_v5, %v722_v5 }
 0x21b   :  { %733 = vmatmul.bf16.vlgmr.msrb.gmra.mxu0 %v723_v33  ;;  %746 = vmatmul.bf16.vlgmr.msrb.gmra.mxu1 %v723_v33 }
 0x21c   :  { %759 = vmatmul.bf16.vlgmr.msrb.gmra.mxu2 %v723_v33  ;;  %772 = vmatmul.bf16.vlgmr.msrb.gmra.mxu3 %v723_v33 }
 0x21d   :  { %1025 = vmatpush.bf16.msrb.mxu0 %v1847_v4  ;;  %1038 = vmatpush.bf16.msrb.mxu1 %v1849_v8 }
 0x21e   :  { %1051 = vmatpush.bf16.msrb.mxu2 %v1852_v12  ;;  %1064 = vmatpush.bf16.msrb.mxu3 %v1854_v13 }
 0x221   :  { %1026 = vmatpush.bf16.msrb.mxu0 %v1857_v17  ;;  %1039 = vmatpush.bf16.msrb.mxu1 %v1861_v21 }
 0x222   :  { %1052 = vmatpush.bf16.msrb.mxu2 %v1863_v22  ;;  %1065 = vmatpush.bf16.msrb.mxu3 %v1868_v26 }
 0x225   :  { %1027 = vmatpush.bf16.msrb.mxu0 %v1871_v30  ;;  %1040 = vmatpush.bf16.msrb.mxu1 %v1874_v34 }
 0x226   :  { %1053 = vmatpush.bf16.msrb.mxu2 %v1878_v38  ;;  %1066 = vmatpush.bf16.msrb.mxu3 %v1880_v39 }
 0x229   :  { %1028 = vmatpush.bf16.msrb.mxu0 %v1883_v46  ;;  %1041 = vmatpush.bf16.msrb.mxu1 %v1886_v48 }
 0x22a   :  { %1054 = vmatpush.bf16.msrb.mxu2 %v1890_v51  ;;  %1067 = vmatpush.bf16.msrb.mxu3 %v1892_v52 }
 0x22d   :  { %1029 = vmatpush.bf16.msrb.mxu0 %v1898_v60  ;;  %1042 = vmatpush.bf16.msrb.mxu1 %v1901_v61 }
 0x22e   :  { %1055 = vmatpush.bf16.msrb.mxu2 %v1905_v1  ;;  %1068 = vmatpush.bf16.msrb.mxu3 %v1907_v2 }
 0x231   :  { %1030 = vmatpush.bf16.msrb.mxu0 %v1910_v11  ;;  %1043 = vmatpush.bf16.msrb.mxu1 %v1913_v14 }
 0x232   :  { %1056 = vmatpush.bf16.msrb.mxu2 %v1917_v18  ;;  %1069 = vmatpush.bf16.msrb.mxu3 %v1919_v19 }
 0x235   :  { %1031 = vmatpush.bf16.msrb.mxu0 %v1925_v31  ;;  %1044 = vmatpush.bf16.msrb.mxu1 %v1928_v32 }
 0x236   :  { %1057 = vmatpush.bf16.msrb.mxu2 %v1932_v36  ;;  %1070 = vmatpush.bf16.msrb.mxu3 %v1934_v37 }
 0x239   :  { %1032 = vmatpush.bf16.msrb.mxu0 %v1937_v47  ;;  %1045 = vmatpush.bf16.msrb.mxu1 %v1940_v49 }
 0x23a   :  { %1058 = vmatpush.bf16.msrb.mxu2 %v1944_v50  ;;  %1071 = vmatpush.bf16.msrb.mxu3 %v1946_v53 }
 0x298   :  { %v734_v35 = vpop.f32.mrf.mxu0  ;;  %v747_v9 = vpop.f32.mrf.mxu1 }
 0x299   :  { %v781_v28 = vrot.slane %v734_v35, 1  ;;  %v793_v24 = vadd.f32 %v734_v35, %v707_v20  ;;  %v782_v29 = vrot.slane %v747_v9, 1  ;;  %v794_v15 = vadd.f32 %v747_v9, %v708_v58  ;;  %v2456_v35 = vld [vmem:[#allocation6_spill] sm:$0xff] }
 0x29a   :  { %v713_v20 = vadd.f32 %v705_v42, %v2060_v40  ;;  %v710_v3 = vadd.f32 %v702_v55, %v2456_v35  ;;  %v714_v9 = vadd.f32 %v706_v56, %v2456_v35 }
 0x29b   :  { %v797_v54 = vadd.f32 %v781_v28, %v711_v7  ;;  %v801_v5 = vmul.f32 0.5, %v793_v24  ;;  %v798_v33 = vadd.f32 %v782_v29, %v712_v44  ;;  %v802_v57 = vmul.f32 0.5, %v794_v15 }
 0x29d   :  { %v804_v25 = vmul.f32 0.5, %v797_v54  ;;  %1688 = vtanh.f32 %v801_v5  ;;  %v805_v45 = vmul.f32 0.5, %v798_v33 }
 0x29e   :  { %1690 = vtanh.f32 %v802_v57 }
 0x29f   :  { %1692 = vtanh.f32 %v804_v25  ;;  %v760_v58 = vpop.f32.mrf.mxu2  ;;  %v773_v41 = vpop.f32.mrf.mxu3 }
 0x2a0   :  { %1694 = vtanh.f32 %v805_v45  ;;  %v783_v43 = vrot.slane %v760_v58, 1  ;;  %v795_v7 = vadd.f32 %v760_v58, %v709_v0  ;;  %v784_v44 = vrot.slane %v773_v41, 1  ;;  %v736_v28 = vpop.f32.mrf.mxu0  ;;  %v749_v24 = vpop.f32.mrf.mxu1 }
 0x2a1   :  { %v796_v29 = vadd.f32 %v773_v41, %v710_v3 }
 0x2a2   :  { %v799_v15 = vadd.f32 %v783_v43, %v713_v20  ;;  %v803_v54 = vmul.f32 0.5, %v795_v7  ;;  %v800_v5 = vadd.f32 %v784_v44, %v714_v9 }
 0x2a3   :  { %v1689_v27 = vpop.eup %1688  ;;  %1696 = vtanh.f32 %v796_v29 }
 0x2a4   :  { %v1691_v33 = vpop.eup %1690  ;;  %v813_v42 = vmul.f32 0.5, %v1689_v27  ;;  %v806_v57 = vmul.f32 0.5, %v799_v15  ;;  %1698 = vtanh.f32 %v800_v5 }
 0x2a5   :  { %v1693_v25 = vpop.eup %1692  ;;  %v814_v55 = vmul.f32 0.5, %v1691_v33  ;;  %1700 = vtanh.f32 %v803_v54 }
 0x2a6   :  { %v1695_v56 = vpop.eup %1694  ;;  %v816_v35 = vmul.f32 0.5, %v1693_v25  ;;  %v819_v45 = vadd.f32 0.5, %v813_v42  ;;  %1702 = vtanh.f32 %v806_v57 }
 0x2a7   :  { %v817_v0 = vmul.f32 0.5, %v1695_v56  ;;  %v820_v58 = vadd.f32 0.5, %v814_v55  ;;  %v762_v28 = vpop.f32.mrf.mxu2  ;;  %v775_v24 = vpop.f32.mrf.mxu3 }
 0x2a8   :  { %v822_v41 = vadd.f32 0.5, %v816_v35 }
 0x2a9   :  { %v1697_v20 = vpop.eup %1696  ;;  %v823_v3 = vadd.f32 0.5, %v817_v0  ;;  %v827_v9 = vmul.f32 %v820_v58, %v2208_v16 }
 0x2aa   :  { %v829_v43 = vmul.f32 %v1697_v20, %v819_v45  ;;  %v1699_v7 = vpop.eup %1698  ;;  %v842_v20 = vpop.permute.xlu0 %841 }
 0x2ab   :  { %v828_v44 = vmul.f32 %v823_v3, %v2210_v63  ;;  %v1701_v29 = vpop.eup %1700  ;;  %v830_v15 = vmul.f32 %v1699_v7, %v822_v41  ;;  %v847_v3 = vpop.permute.xlu2 %846 }
 0x2ac   :  { %v2265_v5 = vadd.f32 %v829_v43, %v827_v9  ;;  %v1703_v27 = vpop.eup %1702  ;;  %v815_v33 = vmul.f32 0.5, %v1701_v29  ;;  %v849_v9 = vmul.f32 %v842_v20, %v2035_v59  ;;  %v850_v43 = vmul.f32 %v842_v20, %v2037_v62 }
 0x2ad   :  { %v2267_v54 = vadd.f32 %v830_v15, %v828_v44  ;;  %v818_v35 = vmul.f32 0.5, %v1703_v27  ;;  %v853_v7 = vmul.f32 %v847_v3, %v2035_v59  ;;  %v854_v44 = vmul.f32 %v847_v3, %v2037_v62 }
 0x2ae   :  { %1704 = vtanh.f32 %v2265_v5  ;;  %v821_v42 = vadd.f32 0.5, %v815_v33  ;;  %v857_v29 = vadd.f32 %v849_v9, %v2043_v6  ;;  %v858_v15 = vadd.f32 %v850_v43, %v2049_v10 }
 0x2af   :  { %1706 = vtanh.f32 %v2267_v54  ;;  %v824_v16 = vadd.f32 0.5, %v818_v35  ;;  %v861_v27 = vadd.f32 %v853_v7, %v2043_v6  ;;  %v862_v35 = vadd.f32 %v854_v44, %v2049_v10 }
 0x2b4   :  { %v1705_v57 = vpop.eup %1704 }
 0x2b5   :  { %v835_v25 = vmul.f32 %v1705_v57, %v821_v42  ;;  %v1707_v55 = vpop.eup %1706 }
 0x2b6   :  { %v836_v56 = vmul.f32 %v1707_v55, %v824_v16 }
 0x2b7   :  { %v865_v63 = vpack.c.bf16 %v835_v25, %v835_v25 }
 0x2b8   :  { %v866_v45 = vpack.c.bf16 %v836_v56, %v836_v56  ;;  %v2457_v56 = vld [vmem:[#allocation5_spill] sm:$0xff] }
 0x2b9   :  { %v869_v58 = vunpack.c.l.b16 %v865_v63  ;;  %v855_v63 = vmul.f32 %v847_v3, %v2457_v56 }
 0x2ba   :  { %v870_v0 = vunpack.c.l.b16 %v866_v45  ;;  %v856_v45 = vmul.f32 %v847_v3, %v2055_v23 }
 0x2bc   :  { %v871_v28 = vrot.slane %v870_v0, 7  ;;  %v851_v0 = vmul.f32 %v842_v20, %v2457_v56 }
 0x2be   :  { %v872_v24 = vsel %vm421_vm0, %v871_v28, %v869_v58  ;;  %v852_v58 = vmul.f32 %v842_v20, %v2055_v23  ;;  %v859_v44 = vadd.f32 %v851_v0, %v2060_v40 }
 0x2bf   :  { %v873_v41 = vpack.c.b16 %v872_v24, %v872_v24 }
 0x2c1   :  { %883 = vmatmul.bf16.vlgmr.msra.gmra.mxu0 %v873_v41  ;;  %896 = vmatmul.bf16.vlgmr.msra.gmra.mxu1 %v873_v41 }
 0x2c2   :  { %909 = vmatmul.bf16.vlgmr.msra.gmra.mxu2 %v873_v41  ;;  %922 = vmatmul.bf16.vlgmr.msra.gmra.mxu3 %v873_v41 }
 0x2c3   :  { %1175 = vmatpush.bf16.msra.mxu0 %v1847_v4  ;;  %1188 = vmatpush.bf16.msra.mxu1 %v1849_v8 }
 0x2c4   :  { %1201 = vmatpush.bf16.msra.mxu2 %v1852_v12  ;;  %1214 = vmatpush.bf16.msra.mxu3 %v1854_v13 }
 0x2c7   :  { %1176 = vmatpush.bf16.msra.mxu0 %v1857_v17  ;;  %1189 = vmatpush.bf16.msra.mxu1 %v1861_v21 }
 0x2c8   :  { %1202 = vmatpush.bf16.msra.mxu2 %v1863_v22  ;;  %1215 = vmatpush.bf16.msra.mxu3 %v1868_v26 }
 0x2cb   :  { %1177 = vmatpush.bf16.msra.mxu0 %v1871_v30  ;;  %1190 = vmatpush.bf16.msra.mxu1 %v1874_v34 }
 0x2cc   :  { %1203 = vmatpush.bf16.msra.mxu2 %v1878_v38  ;;  %1216 = vmatpush.bf16.msra.mxu3 %v1880_v39 }
 0x2cf   :  { %1178 = vmatpush.bf16.msra.mxu0 %v1883_v46  ;;  %1191 = vmatpush.bf16.msra.mxu1 %v1886_v48 }
 0x2d0   :  { %1204 = vmatpush.bf16.msra.mxu2 %v1890_v51  ;;  %1217 = vmatpush.bf16.msra.mxu3 %v1892_v52 }
 0x2d3   :  { %1179 = vmatpush.bf16.msra.mxu0 %v1898_v60  ;;  %1192 = vmatpush.bf16.msra.mxu1 %v1901_v61 }
 0x2d4   :  { %1205 = vmatpush.bf16.msra.mxu2 %v1905_v1  ;;  %1218 = vmatpush.bf16.msra.mxu3 %v1907_v2 }
 0x2d7   :  { %1180 = vmatpush.bf16.msra.mxu0 %v1910_v11  ;;  %1193 = vmatpush.bf16.msra.mxu1 %v1913_v14 }
 0x2d8   :  { %1206 = vmatpush.bf16.msra.mxu2 %v1917_v18  ;;  %1219 = vmatpush.bf16.msra.mxu3 %v1919_v19 }
 0x2db   :  { %1181 = vmatpush.bf16.msra.mxu0 %v1925_v31  ;;  %1194 = vmatpush.bf16.msra.mxu1 %v1928_v32 }
 0x2dc   :  { %1207 = vmatpush.bf16.msra.mxu2 %v1932_v36  ;;  %1220 = vmatpush.bf16.msra.mxu3 %v1934_v37 }
 0x2df   :  { %1182 = vmatpush.bf16.msra.mxu0 %v1937_v47  ;;  %1195 = vmatpush.bf16.msra.mxu1 %v1940_v49 }
 0x2e0   :  { %1208 = vmatpush.bf16.msra.mxu2 %v1944_v50  ;;  %1221 = vmatpush.bf16.msra.mxu3 %v1946_v53 }
 0x33e   :  { %v884_v33 = vpop.f32.mrf.mxu0  ;;  %v897_v42 = vpop.f32.mrf.mxu1 }
 0x33f   :  { %v931_v57 = vrot.slane %v884_v33, 1  ;;  %v943_v16 = vadd.f32 %v884_v33, %v857_v29  ;;  %v932_v25 = vrot.slane %v897_v42, 1  ;;  %v944_v55 = vadd.f32 %v897_v42, %v858_v15  ;;  %v2458_v33 = vld [vmem:[#allocation6_spill] sm:$0xff] }
 0x340   :  { %v863_v29 = vadd.f32 %v855_v63, %v2060_v40  ;;  %v860_v3 = vadd.f32 %v852_v58, %v2458_v33  ;;  %v864_v42 = vadd.f32 %v856_v45, %v2458_v33 }
 0x341   :  { %v947_v28 = vadd.f32 %v931_v57, %v861_v27  ;;  %v951_v24 = vmul.f32 0.5, %v943_v16  ;;  %v948_v41 = vadd.f32 %v932_v25, %v862_v35  ;;  %v952_v9 = vmul.f32 0.5, %v944_v55 }
 0x343   :  { %v954_v43 = vmul.f32 0.5, %v947_v28  ;;  %1708 = vtanh.f32 %v951_v24  ;;  %v955_v7 = vmul.f32 0.5, %v948_v41 }
 0x344   :  { %1710 = vtanh.f32 %v952_v9 }
 0x345   :  { %1712 = vtanh.f32 %v954_v43  ;;  %v910_v15 = vpop.f32.mrf.mxu2  ;;  %v923_v56 = vpop.f32.mrf.mxu3 }
 0x346   :  { %1714 = vtanh.f32 %v955_v7  ;;  %v933_v20 = vrot.slane %v910_v15, 1  ;;  %v945_v27 = vadd.f32 %v910_v15, %v859_v44  ;;  %v934_v35 = vrot.slane %v923_v56, 1  ;;  %v886_v57 = vpop.f32.mrf.mxu0  ;;  %v899_v16 = vpop.f32.mrf.mxu1 }
 0x347   :  { %v946_v25 = vadd.f32 %v923_v56, %v860_v3 }
 0x348   :  { %v949_v55 = vadd.f32 %v933_v20, %v863_v29  ;;  %v953_v28 = vmul.f32 0.5, %v945_v27  ;;  %v950_v24 = vadd.f32 %v934_v35, %v864_v42 }
 0x349   :  { %v1709_v0 = vpop.eup %1708  ;;  %1716 = vtanh.f32 %v946_v25 }
 0x34a   :  { %v1711_v41 = vpop.eup %1710  ;;  %v963_v63 = vmul.f32 0.5, %v1709_v0  ;;  %v956_v9 = vmul.f32 0.5, %v949_v55  ;;  %1718 = vtanh.f32 %v950_v24 }
 0x34b   :  { %v1713_v43 = vpop.eup %1712  ;;  %v964_v58 = vmul.f32 0.5, %v1711_v41  ;;  %1720 = vtanh.f32 %v953_v28 }
 0x34c   :  { %v1715_v45 = vpop.eup %1714  ;;  %v966_v33 = vmul.f32 0.5, %v1713_v43  ;;  %v969_v7 = vadd.f32 0.5, %v963_v63  ;;  %1722 = vtanh.f32 %v956_v9 }
 0x34d   :  { %v967_v44 = vmul.f32 0.5, %v1715_v45  ;;  %v970_v15 = vadd.f32 0.5, %v964_v58  ;;  %v912_v57 = vpop.f32.mrf.mxu2  ;;  %v925_v16 = vpop.f32.mrf.mxu3 }
 0x34e   :  { %v972_v56 = vadd.f32 0.5, %v966_v33 }
 0x34f   :  { %v1717_v29 = vpop.eup %1716  ;;  %v973_v3 = vadd.f32 0.5, %v967_v44  ;;  %v977_v42 = vmul.f32 %v970_v15, %v2265_v5 }
 0x350   :  { %v979_v20 = vmul.f32 %v1717_v29, %v969_v7  ;;  %v1719_v27 = vpop.eup %1718 }
 0x351   :  { %v978_v35 = vmul.f32 %v973_v3, %v2267_v54  ;;  %v1721_v25 = vpop.eup %1720  ;;  %v980_v55 = vmul.f32 %v1719_v27, %v972_v56 }
 0x352   :  { %v2322_v24 = vadd.f32 %v979_v20, %v977_v42  ;;  %v1723_v0 = vpop.eup %1722  ;;  %v965_v41 = vmul.f32 0.5, %v1721_v25 }
 0x353   :  { %v2324_v28 = vadd.f32 %v980_v55, %v978_v35  ;;  %v968_v33 = vmul.f32 0.5, %v1723_v0 }
 0x354   :  { %1724 = vtanh.f32 %v2322_v24  ;;  %v971_v63 = vadd.f32 0.5, %v965_v41 }
 0x355   :  { %1726 = vtanh.f32 %v2324_v28  ;;  %v974_v5 = vadd.f32 0.5, %v968_v33 }
 0x35a   :  { %v1725_v9 = vpop.eup %1724 }
 0x35b   :  { %v985_v43 = vmul.f32 %v1725_v9, %v971_v63  ;;  %v1727_v58 = vpop.eup %1726 }
 0x35c   :  { %v986_v45 = vmul.f32 %v1727_v58, %v974_v5 }
 0x35d   :  { %v1015_v54 = vpack.c.bf16 %v985_v43, %v985_v43 }
 0x35e   :  { %v1016_v7 = vpack.c.bf16 %v986_v45, %v986_v45 }
 0x35f   :  { %v1019_v15 = vunpack.c.l.b16 %v1015_v54 }
 0x360   :  { %v1020_v44 = vunpack.c.l.b16 %v1016_v7 }
 0x362   :  { %v1021_v57 = vrot.slane %v1020_v44, 7 }
 0x364   :  { %v1022_v16 = vsel %vm421_vm0, %v1021_v57, %v1019_v15 }
 0x365   :  { %v1023_v56 = vpack.c.b16 %v1022_v16, %v1022_v16 }
 0x367   :  { %1033 = vmatmul.bf16.vlgmr.msrb.gmra.mxu0 %v1023_v56  ;;  %1046 = vmatmul.bf16.vlgmr.msrb.gmra.mxu1 %v1023_v56 }
 0x368   :  { %1059 = vmatmul.bf16.vlgmr.msrb.gmra.mxu2 %v1023_v56  ;;  %1072 = vmatmul.bf16.vlgmr.msrb.gmra.mxu3 %v1023_v56 }
 0x369   :  { %1325 = vmatpush.bf16.msrb.mxu0 %v1847_v4  ;;  %1338 = vmatpush.bf16.msrb.mxu1 %v1849_v8  ;;  %v992_v4 = vpop.permute.xlu2 %991  ;;  %v997_v8 = vpop.permute.xlu1 %996 }
 0x36a   :  { %1351 = vmatpush.bf16.msrb.mxu2 %v1852_v12  ;;  %1364 = vmatpush.bf16.msrb.mxu3 %v1854_v13  ;;  %v999_v12 = vmul.f32 %v992_v4, %v2035_v59  ;;  %v1000_v13 = vmul.f32 %v992_v4, %v2037_v62 }
 0x36d   :  { %1326 = vmatpush.bf16.msrb.mxu0 %v1857_v17  ;;  %1339 = vmatpush.bf16.msrb.mxu1 %v1861_v21  ;;  %v1003_v17 = vmul.f32 %v997_v8, %v2035_v59  ;;  %v1004_v21 = vmul.f32 %v997_v8, %v2037_v62 }
 0x36e   :  { %1352 = vmatpush.bf16.msrb.mxu2 %v1863_v22  ;;  %1365 = vmatpush.bf16.msrb.mxu3 %v1868_v26  ;;  %v1007_v22 = vadd.f32 %v999_v12, %v2043_v6  ;;  %v1008_v26 = vadd.f32 %v1000_v13, %v2049_v10 }
 0x371   :  { %1327 = vmatpush.bf16.msrb.mxu0 %v1871_v30  ;;  %1340 = vmatpush.bf16.msrb.mxu1 %v1874_v34  ;;  %v1011_v30 = vadd.f32 %v1003_v17, %v2043_v6 }
 0x372   :  { %1353 = vmatpush.bf16.msrb.mxu2 %v1878_v38  ;;  %1366 = vmatpush.bf16.msrb.mxu3 %v1880_v39  ;;  %v1012_v38 = vadd.f32 %v1004_v21, %v2049_v10 }
 0x375   :  { %1328 = vmatpush.bf16.msrb.mxu0 %v1883_v46  ;;  %1341 = vmatpush.bf16.msrb.mxu1 %v1886_v48 }
 0x376   :  { %1354 = vmatpush.bf16.msrb.mxu2 %v1890_v51  ;;  %1367 = vmatpush.bf16.msrb.mxu3 %v1892_v52 }
 0x379   :  { %1329 = vmatpush.bf16.msrb.mxu0 %v1898_v60  ;;  %1342 = vmatpush.bf16.msrb.mxu1 %v1901_v61  ;;  %v2459_v60 = vld [vmem:[#allocation5_spill] sm:$0xff] }
 0x37a   :  { %1355 = vmatpush.bf16.msrb.mxu2 %v1905_v1  ;;  %1368 = vmatpush.bf16.msrb.mxu3 %v1907_v2  ;;  %v1005_v61 = vmul.f32 %v997_v8, %v2459_v60  ;;  %v1006_v1 = vmul.f32 %v997_v8, %v2055_v23  ;;  %v1001_v2 = vmul.f32 %v992_v4, %v2459_v60 }
 0x37d   :  { %1330 = vmatpush.bf16.msrb.mxu0 %v1910_v11  ;;  %1343 = vmatpush.bf16.msrb.mxu1 %v1913_v14  ;;  %v1002_v11 = vmul.f32 %v992_v4, %v2055_v23 }
 0x37e   :  { %1356 = vmatpush.bf16.msrb.mxu2 %v1917_v18  ;;  %1369 = vmatpush.bf16.msrb.mxu3 %v1919_v19 }
 0x381   :  { %1331 = vmatpush.bf16.msrb.mxu0 %v1925_v31  ;;  %1344 = vmatpush.bf16.msrb.mxu1 %v1928_v32 }
 0x382   :  { %1357 = vmatpush.bf16.msrb.mxu2 %v1932_v36  ;;  %1370 = vmatpush.bf16.msrb.mxu3 %v1934_v37  ;;  %v1009_v37 = vadd.f32 %v1001_v2, %v2060_v40 }
 0x385   :  { %1332 = vmatpush.bf16.msrb.mxu0 %v1937_v47  ;;  %1345 = vmatpush.bf16.msrb.mxu1 %v1940_v49  ;;  %v1013_v47 = vadd.f32 %v1005_v61, %v2060_v40 }
 0x386   :  { %1358 = vmatpush.bf16.msrb.mxu2 %v1944_v50  ;;  %1371 = vmatpush.bf16.msrb.mxu3 %v1946_v53  ;;  %v2460_v50 = vld [vmem:[#allocation6_spill] sm:$0xff] }
 0x387   :  { %v1010_v53 = vadd.f32 %v1002_v11, %v2460_v50  ;;  %v1014_v29 = vadd.f32 %v1006_v1, %v2460_v50 }
 0x3e4   :  { %v1034_v34 = vpop.f32.mrf.mxu0  ;;  %v1047_v39 = vpop.f32.mrf.mxu1 }
 0x3e5   :  { %v1081_v46 = vrot.slane %v1034_v34, 1  ;;  %v1093_v48 = vadd.f32 %v1034_v34, %v1007_v22  ;;  %v1082_v51 = vrot.slane %v1047_v39, 1  ;;  %v1094_v52 = vadd.f32 %v1047_v39, %v1008_v26 }
 0x3e7   :  { %v1097_v14 = vadd.f32 %v1081_v46, %v1011_v30  ;;  %v1101_v18 = vmul.f32 0.5, %v1093_v48  ;;  %v1098_v19 = vadd.f32 %v1082_v51, %v1012_v38  ;;  %v1102_v31 = vmul.f32 0.5, %v1094_v52 }
 0x3e9   :  { %v1104_v32 = vmul.f32 0.5, %v1097_v14  ;;  %1728 = vtanh.f32 %v1101_v18  ;;  %v1105_v36 = vmul.f32 0.5, %v1098_v19 }
 0x3ea   :  { %1730 = vtanh.f32 %v1102_v31 }
 0x3eb   :  { %1732 = vtanh.f32 %v1104_v32  ;;  %v1060_v49 = vpop.f32.mrf.mxu2  ;;  %v1073_v3 = vpop.f32.mrf.mxu3 }
 0x3ec   :  { %1734 = vtanh.f32 %v1105_v36  ;;  %v1083_v42 = vrot.slane %v1060_v49, 1  ;;  %v1095_v20 = vadd.f32 %v1060_v49, %v1009_v37  ;;  %v1084_v27 = vrot.slane %v1073_v3, 1  ;;  %v1036_v35 = vpop.f32.mrf.mxu0  ;;  %v1049_v25 = vpop.f32.mrf.mxu1 }
 0x3ed   :  { %v1096_v55 = vadd.f32 %v1073_v3, %v1010_v53  ;;  %v1142_v36 = vpop.permute.xlu1 %1141  ;;  %v1147_v37 = vpop.permute.xlu0 %1146 }
 0x3ee   :  { %v1099_v0 = vadd.f32 %v1083_v42, %v1013_v47  ;;  %v1103_v41 = vmul.f32 0.5, %v1095_v20  ;;  %v1100_v33 = vadd.f32 %v1084_v27, %v1014_v29  ;;  %v1149_v47 = vmul.f32 %v1142_v36, %v2035_v59 }
 0x3ef   :  { %v1729_v63 = vpop.eup %1728  ;;  %1736 = vtanh.f32 %v1096_v55  ;;  %v1150_v49 = vmul.f32 %v1142_v36, %v2037_v62  ;;  %v1153_v53 = vmul.f32 %v1147_v37, %v2035_v59  ;;  %v1154_v29 = vmul.f32 %v1147_v37, %v2037_v62 }
 0x3f0   :  { %v1731_v9 = vpop.eup %1730  ;;  %v1113_v5 = vmul.f32 0.5, %v1729_v63  ;;  %v1106_v43 = vmul.f32 0.5, %v1099_v0  ;;  %1738 = vtanh.f32 %v1100_v33  ;;  %v1157_v3 = vadd.f32 %v1149_v47, %v2043_v6 }
 0x3f1   :  { %v1733_v58 = vpop.eup %1732  ;;  %v1114_v45 = vmul.f32 0.5, %v1731_v9  ;;  %1740 = vtanh.f32 %v1103_v41  ;;  %v1158_v42 = vadd.f32 %v1150_v49, %v2049_v10  ;;  %v1161_v20 = vadd.f32 %v1153_v53, %v2043_v6 }
 0x3f2   :  { %v1735_v54 = vpop.eup %1734  ;;  %v1116_v7 = vmul.f32 0.5, %v1733_v58  ;;  %v1119_v44 = vadd.f32 0.5, %v1113_v5  ;;  %1742 = vtanh.f32 %v1106_v43  ;;  %v1162_v35 = vadd.f32 %v1154_v29, %v2049_v10 }
 0x3f3   :  { %v1117_v15 = vmul.f32 0.5, %v1735_v54  ;;  %v1120_v57 = vadd.f32 0.5, %v1114_v45  ;;  %v1062_v16 = vpop.f32.mrf.mxu2  ;;  %v1075_v56 = vpop.f32.mrf.mxu3  ;;  %v1155_v63 = vmul.f32 %v1147_v37, %v2459_v60  ;;  %v1156_v9 = vmul.f32 %v1147_v37, %v2055_v23 }
 0x3f4   :  { %v1122_v4 = vadd.f32 0.5, %v1116_v7  ;;  %v1151_v5 = vmul.f32 %v1142_v36, %v2459_v60  ;;  %v1152_v43 = vmul.f32 %v1142_v36, %v2055_v23 }
 0x3f5   :  { %v1737_v8 = vpop.eup %1736  ;;  %v1123_v12 = vadd.f32 0.5, %v1117_v15  ;;  %v1127_v13 = vmul.f32 %v1120_v57, %v2322_v24  ;;  %v1163_v16 = vadd.f32 %v1155_v63, %v2060_v40 }
 0x3f6   :  { %v1129_v17 = vmul.f32 %v1737_v8, %v1119_v44  ;;  %v1739_v21 = vpop.eup %1738  ;;  %v1159_v57 = vadd.f32 %v1151_v5, %v2060_v40  ;;  %v1164_v8 = vadd.f32 %v1156_v9, %v2460_v50 }
 0x3f7   :  { %v1128_v22 = vmul.f32 %v1123_v12, %v2324_v28  ;;  %v1741_v26 = vpop.eup %1740  ;;  %v1130_v30 = vmul.f32 %v1739_v21, %v1122_v4  ;;  %v1160_v4 = vadd.f32 %v1152_v43, %v2460_v50 }
 0x3f8   :  { %v2379_v34 = vadd.f32 %v1129_v17, %v1127_v13  ;;  %v1743_v38 = vpop.eup %1742  ;;  %v1115_v46 = vmul.f32 0.5, %v1741_v26 }
 0x3f9   :  { %v2381_v39 = vadd.f32 %v1130_v30, %v1128_v22  ;;  %v1118_v48 = vmul.f32 0.5, %v1743_v38 }
 0x3fa   :  { %1744 = vtanh.f32 %v2379_v34  ;;  %v1121_v51 = vadd.f32 0.5, %v1115_v46 }
 0x3fb   :  { %1746 = vtanh.f32 %v2381_v39  ;;  %v1124_v24 = vadd.f32 0.5, %v1118_v48 }
 0x400   :  { %v1745_v52 = vpop.eup %1744 }
 0x401   :  { %v1135_v61 = vmul.f32 %v1745_v52, %v1121_v51  ;;  %v1747_v1 = vpop.eup %1746 }
 0x402   :  { %v1136_v2 = vmul.f32 %v1747_v1, %v1124_v24 }
 0x403   :  { %v1165_v28 = vpack.c.bf16 %v1135_v61, %v1135_v61 }
 0x404   :  { %v1166_v11 = vpack.c.bf16 %v1136_v2, %v1136_v2 }
 0x405   :  { %v1169_v18 = vunpack.c.l.b16 %v1165_v28 }
 0x406   :  { %v1170_v14 = vunpack.c.l.b16 %v1166_v11 }
 0x408   :  { %v1171_v19 = vrot.slane %v1170_v14, 7 }
 0x40a   :  { %v1172_v31 = vsel %vm421_vm0, %v1171_v19, %v1169_v18 }
 0x40b   :  { %v1173_v32 = vpack.c.b16 %v1172_v31, %v1172_v31 }
 0x40d   :  { %1183 = vmatmul.bf16.vlgmr.msra.gmra.mxu0 %v1173_v32  ;;  %1196 = vmatmul.bf16.vlgmr.msra.gmra.mxu1 %v1173_v32 }
 0x40e   :  { %1209 = vmatmul.bf16.vlgmr.msra.gmra.mxu2 %v1173_v32  ;;  %1222 = vmatmul.bf16.vlgmr.msra.gmra.mxu3 %v1173_v32 }
 0x48a   :  { %v1184_v27 = vpop.f32.mrf.mxu0  ;;  %v1197_v25 = vpop.f32.mrf.mxu1 }
 0x48b   :  { %v1231_v55 = vrot.slane %v1184_v27, 1  ;;  %v1243_v0 = vadd.f32 %v1184_v27, %v1157_v3  ;;  %v1232_v41 = vrot.slane %v1197_v25, 1  ;;  %v1244_v33 = vadd.f32 %v1197_v25, %v1158_v42 }
 0x48d   :  { %v1247_v58 = vadd.f32 %v1231_v55, %v1161_v20  ;;  %v1251_v45 = vmul.f32 0.5, %v1243_v0  ;;  %v1248_v54 = vadd.f32 %v1232_v41, %v1162_v35  ;;  %v1252_v7 = vmul.f32 0.5, %v1244_v33 }
 0x48f   :  { %v1254_v44 = vmul.f32 0.5, %v1247_v58  ;;  %1748 = vtanh.f32 %v1251_v45  ;;  %v1255_v15 = vmul.f32 0.5, %v1248_v54 }
 0x490   :  { %1750 = vtanh.f32 %v1252_v7 }
 0x491   :  { %1752 = vtanh.f32 %v1254_v44  ;;  %v1210_v56 = vpop.f32.mrf.mxu2  ;;  %v1223_v12 = vpop.f32.mrf.mxu3 }
 0x492   :  { %1754 = vtanh.f32 %v1255_v15  ;;  %v1233_v13 = vrot.slane %v1210_v56, 1  ;;  %v1245_v17 = vadd.f32 %v1210_v56, %v1159_v57  ;;  %v1234_v21 = vrot.slane %v1223_v12, 1  ;;  %v1186_v22 = vpop.f32.mrf.mxu0  ;;  %v1199_v26 = vpop.f32.mrf.mxu1 }
 0x493   :  { %v1246_v30 = vadd.f32 %v1223_v12, %v1160_v4  ;;  %v1292_v15 = vpop.permute.xlu0 %1291  ;;  %v1297_v57 = vpop.permute.xlu2 %1296 }
 0x494   :  { %v1249_v38 = vadd.f32 %v1233_v13, %v1163_v16  ;;  %v1253_v46 = vmul.f32 0.5, %v1245_v17  ;;  %v1250_v48 = vadd.f32 %v1234_v21, %v1164_v8  ;;  %v1299_v16 = vmul.f32 %v1292_v15, %v2035_v59 }
 0x495   :  { %v1749_v51 = vpop.eup %1748  ;;  %1756 = vtanh.f32 %v1246_v30  ;;  %v1300_v56 = vmul.f32 %v1292_v15, %v2037_v62  ;;  %v1303_v4 = vmul.f32 %v1297_v57, %v2035_v59  ;;  %v1304_v8 = vmul.f32 %v1297_v57, %v2037_v62 }
 0x496   :  { %v1751_v52 = vpop.eup %1750  ;;  %v1263_v24 = vmul.f32 0.5, %v1749_v51  ;;  %v1256_v61 = vmul.f32 0.5, %v1249_v38  ;;  %1758 = vtanh.f32 %v1250_v48  ;;  %v1307_v12 = vadd.f32 %v1299_v16, %v2043_v6 }
 0x497   :  { %v1753_v1 = vpop.eup %1752  ;;  %v1264_v2 = vmul.f32 0.5, %v1751_v52  ;;  %1760 = vtanh.f32 %v1253_v46  ;;  %v1308_v13 = vadd.f32 %v1300_v56, %v2049_v10  ;;  %v1311_v17 = vadd.f32 %v1303_v4, %v2043_v6 }
 0x498   :  { %v1755_v28 = vpop.eup %1754  ;;  %v1266_v11 = vmul.f32 0.5, %v1753_v1  ;;  %v1269_v14 = vadd.f32 0.5, %v1263_v24  ;;  %1762 = vtanh.f32 %v1256_v61  ;;  %v1312_v21 = vadd.f32 %v1304_v8, %v2049_v10 }
 0x499   :  { %v1267_v18 = vmul.f32 0.5, %v1755_v28  ;;  %v1270_v19 = vadd.f32 0.5, %v1264_v2  ;;  %v1212_v31 = vpop.f32.mrf.mxu2  ;;  %v1225_v32 = vpop.f32.mrf.mxu3  ;;  %v1301_v51 = vmul.f32 %v1292_v15, %v2459_v60  ;;  %v1302_v59 = vmul.f32 %v1292_v15, %v2055_v23 }
 0x49a   :  { %v1272_v36 = vadd.f32 0.5, %v1266_v11  ;;  %v1305_v62 = vmul.f32 %v1297_v57, %v2459_v60  ;;  %v1306_v52 = vmul.f32 %v1297_v57, %v2055_v23 }
 0x49b   :  { %v1757_v37 = vpop.eup %1756  ;;  %v1273_v47 = vadd.f32 0.5, %v1267_v18  ;;  %v1277_v49 = vmul.f32 %v1270_v19, %v2379_v34  ;;  %v1309_v28 = vadd.f32 %v1301_v51, %v2060_v40  ;;  %v1310_v60 = vadd.f32 %v1302_v59, %v2460_v50  ;;  %v1627_v51 = vld [vmem:[%s2441_s2 + $0x3] ss:$0 sm:$0xff] }
 0x49c   :  { %v1279_v53 = vmul.f32 %v1757_v37, %v1269_v14  ;;  %v1759_v29 = vpop.eup %1758  ;;  %v1313_v11 = vadd.f32 %v1305_v62, %v2060_v40  ;;  %v1314_v14 = vadd.f32 %v1306_v52, %v2460_v50 }
 0x49d   :  { %v1278_v3 = vmul.f32 %v1273_v47, %v2381_v39  ;;  %v1761_v42 = vpop.eup %1760  ;;  %v1280_v20 = vmul.f32 %v1759_v29, %v1272_v36 }
 0x49e   :  { %v2404_v27 = vadd.f32 %v1279_v53, %v1277_v49  ;;  %v1763_v35 = vpop.eup %1762  ;;  %v1265_v55 = vmul.f32 0.5, %v1761_v42 }
 0x49f   :  { %v2406_v25 = vadd.f32 %v1280_v20, %v1278_v3  ;;  %v1268_v0 = vmul.f32 0.5, %v1763_v35 }
 0x4a0   :  { %1764 = vtanh.f32 %v2404_v27  ;;  %v1271_v41 = vadd.f32 0.5, %v1265_v55 }
 0x4a1   :  { %1766 = vtanh.f32 %v2406_v25  ;;  %v1274_v34 = vadd.f32 0.5, %v1268_v0 }
 0x4a6   :  { %v1765_v33 = vpop.eup %1764 }
 0x4a7   :  { %v1285_v63 = vmul.f32 %v1765_v33, %v1271_v41  ;;  %v1767_v9 = vpop.eup %1766 }
 0x4a8   :  { %v1286_v5 = vmul.f32 %v1767_v9, %v1274_v34 }
 0x4a9   :  { %v1315_v39 = vpack.c.bf16 %v1285_v63, %v1285_v63 }
 0x4aa   :  { %v1316_v43 = vpack.c.bf16 %v1286_v5, %v1286_v5 }
 0x4ab   :  { %v1319_v45 = vunpack.c.l.b16 %v1315_v39 }
 0x4ac   :  { %v1320_v58 = vunpack.c.l.b16 %v1316_v43 }
 0x4ae   :  { %v1321_v54 = vrot.slane %v1320_v58, 7 }
 0x4b0   :  { %v1322_v7 = vsel %vm421_vm0, %v1321_v54, %v1319_v45 }
 0x4b1   :  { %v1323_v44 = vpack.c.b16 %v1322_v7, %v1322_v7 }
 0x4b3   :  { %1333 = vmatmul.bf16.vlgmr.msrb.gmra.mxu0 %v1323_v44  ;;  %1346 = vmatmul.bf16.vlgmr.msrb.gmra.mxu1 %v1323_v44 }
 0x4b4   :  { %1359 = vmatmul.bf16.vlgmr.msrb.gmra.mxu2 %v1323_v44  ;;  %1372 = vmatmul.bf16.vlgmr.msrb.gmra.mxu3 %v1323_v44 }
 0x530   :  { %v1334_v22 = vpop.f32.mrf.mxu0  ;;  %v1347_v26 = vpop.f32.mrf.mxu1 }
 0x531   :  { %v1381_v30 = vrot.slane %v1334_v22, 1  ;;  %v1393_v38 = vadd.f32 %v1334_v22, %v1307_v12  ;;  %v1382_v46 = vrot.slane %v1347_v26, 1  ;;  %v1394_v48 = vadd.f32 %v1347_v26, %v1308_v13 }
 0x533   :  { %v1397_v24 = vadd.f32 %v1381_v30, %v1311_v17  ;;  %v1401_v61 = vmul.f32 0.5, %v1393_v38  ;;  %v1398_v1 = vadd.f32 %v1382_v46, %v1312_v21  ;;  %v1402_v6 = vmul.f32 0.5, %v1394_v48 }
 0x535   :  { %v1404_v2 = vmul.f32 0.5, %v1397_v24  ;;  %1768 = vtanh.f32 %v1401_v61  ;;  %v1405_v10 = vmul.f32 0.5, %v1398_v1 }
 0x536   :  { %1770 = vtanh.f32 %v1402_v6 }
 0x537   :  { %1772 = vtanh.f32 %v1404_v2  ;;  %v1360_v18 = vpop.f32.mrf.mxu2  ;;  %v1373_v19 = vpop.f32.mrf.mxu3 }
 0x538   :  { %1774 = vtanh.f32 %v1405_v10  ;;  %v1383_v23 = vrot.slane %v1360_v18, 1  ;;  %v1395_v31 = vadd.f32 %v1360_v18, %v1309_v28  ;;  %v1384_v32 = vrot.slane %v1373_v19, 1  ;;  %v1336_v36 = vpop.f32.mrf.mxu0  ;;  %v1349_v37 = vpop.f32.mrf.mxu1 }
 0x539   :  { %v1396_v47 = vadd.f32 %v1373_v19, %v1310_v60 }
 0x53a   :  { %v1399_v49 = vadd.f32 %v1383_v23, %v1313_v11  ;;  %v1400_v53 = vadd.f32 %v1384_v32, %v1314_v14  ;;  %v1403_v3 = vmul.f32 0.5, %v1395_v31 }
 0x53b   :  { %v1769_v29 = vpop.eup %1768  ;;  %1776 = vtanh.f32 %v1396_v47 }
 0x53c   :  { %v1771_v40 = vpop.eup %1770  ;;  %v1413_v42 = vmul.f32 0.5, %v1769_v29  ;;  %v1406_v20 = vmul.f32 0.5, %v1399_v49  ;;  %1778 = vtanh.f32 %v1400_v53 }
 0x53d   :  { %v1773_v35 = vpop.eup %1772  ;;  %v1414_v55 = vmul.f32 0.5, %v1771_v40  ;;  %1780 = vtanh.f32 %v1403_v3 }
 0x53e   :  { %v1775_v50 = vpop.eup %1774  ;;  %v1416_v0 = vmul.f32 0.5, %v1773_v35  ;;  %v1419_v41 = vadd.f32 0.5, %v1413_v42  ;;  %1782 = vtanh.f32 %v1406_v20 }
 0x53f   :  { %v1417_v33 = vmul.f32 0.5, %v1775_v50  ;;  %v1420_v34 = vadd.f32 0.5, %v1414_v55  ;;  %v1362_v63 = vpop.f32.mrf.mxu2  ;;  %v1375_v9 = vpop.f32.mrf.mxu3 }
 0x540   :  { %v1422_v5 = vadd.f32 0.5, %v1416_v0 }
 0x541   :  { %v1777_v39 = vpop.eup %1776  ;;  %v1423_v43 = vadd.f32 0.5, %v1417_v33  ;;  %v1427_v58 = vmul.f32 %v1420_v34, %v2404_v27  ;;  %v1626_v27 = vld [vmem:[%s2441_s2 + $0x2] ss:$0 sm:$0xff] }
 0x542   :  { %v1429_v45 = vmul.f32 %v1777_v39, %v1419_v41  ;;  %v1779_v54 = vpop.eup %1778 }
 0x543   :  { %v1428_v7 = vmul.f32 %v1423_v43, %v2406_v25  ;;  %v1430_v44 = vmul.f32 %v1779_v54, %v1422_v5  ;;  %v1781_v57 = vpop.eup %1780 }
 0x544   :  { %v1431_v15 = vadd.f32 %v1429_v45, %v1427_v58  ;;  %v1783_v16 = vpop.eup %1782  ;;  %v1415_v4 = vmul.f32 0.5, %v1781_v57 }
 0x545   :  { %v1432_v56 = vadd.f32 %v1430_v44, %v1428_v7  ;;  %v1418_v8 = vmul.f32 0.5, %v1783_v16 }
 0x546   :  { %1784 = vtanh.f32 %v1431_v15  ;;  %v1421_v13 = vadd.f32 0.5, %v1415_v4 }
 0x547   :  { %1786 = vtanh.f32 %v1432_v56  ;;  %v1424_v17 = vadd.f32 0.5, %v1418_v8 }
 0x54c   :  { %v1785_v12 = vpop.eup %1784 }
 0x54d   :  { %v1787_v21 = vpop.eup %1786  ;;  %v1435_v22 = vmul.f32 %v1785_v12, %v1421_v13 }
 0x54e   :  { %v1436_v26 = vmul.f32 %v1787_v21, %v1424_v17 }
 0x54f   :  { %v1438_v30 = vmul.f32 %v1626_v27, %v1435_v22 }
 0x550   :  { %v1439_v25 = vmul.f32 %v1626_v27, %v1436_v26 }
 0x552   :  { %v1442_v38 = vrot.slane %v1439_v25, 7 }
 0x554   :  { %v1443_v46 = vsel %vm421_vm0, %v1442_v38, %v1438_v30 }
 0x555   :  { %v1446_v48 = vsel %vm1445_vm1, %v1443_v46, 0.0 }
 0x556   :  { %1447 = vadd.xlane.f32.xlu1 %v1446_v48 }
 0x5c9   :  { %v1448_v59 = vpop.xlane.xlu1 %1447 }
 0x5ca   :  { %v1450_v62 = vadd.f32 %v1627_v51, %v1448_v59 }
 0x5cc   :  { %1452 = vst.msk [vmem:[%s2442_s3] sm:$0x3] %vm1451_vm2, %v1450_v62 }
 0x5cd   :  { %1457 = vsyncpa [#allocation3], 1 }

</bundles_post_ra>
